<compile_context>
chip_gen: v7x
topology: tpu7x:2x2x1
jax: 0.10.0
libtpu: 0.0.40
codegen_flags: <defaults>
</compile_context>

<pallas_src>
import math
import jax
import jax.numpy as jnp
from jax.experimental import pallas as pl
from jax.experimental.pallas import tpu as pltpu

# ----- small synthetic BERT config -----
B = 2        # batch
S = 8        # sequence length
H = 32       # hidden size
NH = 2       # attention heads
HD = H // NH # head dim
FF = 64      # FFN intermediate
L = 2        # encoder layers
VOCAB = 100  # vocab size
NC = 2       # n_classes (Negative / Positive)
LN_EPS = 1e-12


def _ln(x, g, b):
    """LayerNorm over the last axis; g/b broadcast."""
    mu = jnp.mean(x, axis=-1, keepdims=True)
    var = jnp.mean((x - mu) ** 2, axis=-1, keepdims=True)
    return (x - mu) * jax.lax.rsqrt(var + LN_EPS) * g + b


# --------------------------------------------------------------------------
# Fused Pallas kernel: L encoder layers + pooler + classifier + softmax
# --------------------------------------------------------------------------
def fused_forward_kernel(x_ref, mask_ref,
                         wqkv_ref, bqkv_ref, wo_ref,
                         w1_ref, bf1_ref, w2_ref, hvec_ref,
                         pw_ref, pb_ref, cw_ref, cb_ref,
                         out_ref):
    x = x_ref[...]                                # (B*S, H) resident activations
    mask = mask_ref[...]                          # (B, S), 1 = keep / 0 = pad
    bias = ((1.0 - mask) * -1e9)[:, None, :]      # (B, 1, S) additive bias (f32)
    scale = 1.0 / math.sqrt(HD)

    for l in range(L):                            # static layer loop (L=2)
        hv = hvec_ref[l]                          # (6, H): [bo, g1, b1, bf2, g2, b2]

        # One fused QKV matmul: (B*S, H) @ (H, 3H)
        qkv = (jnp.dot(x, wqkv_ref[l], preferred_element_type=jnp.float32)
               + bqkv_ref[l])                     # (B*S, 3H)

        ctx_heads = []
        for h in range(NH):                       # static head loop (NH=2)
            qh = qkv[:, h * HD:(h + 1) * HD].reshape(B, S, HD)
            kh = qkv[:, H + h * HD:H + (h + 1) * HD].reshape(B, S, HD)
            vh = qkv[:, 2 * H + h * HD:2 * H + (h + 1) * HD].reshape(B, S, HD)
            s = (jnp.einsum('bqd,bkd->bqk', qh, kh,
                            preferred_element_type=jnp.float32) * scale + bias)
            m = jnp.max(s, axis=-1, keepdims=True)
            e = jnp.exp(s - m)
            p = e * pl.reciprocal(jnp.sum(e, axis=-1, keepdims=True), approx=True)
            ctx_heads.append(
                jnp.einsum('bqk,bkd->bqd', p, vh,
                           preferred_element_type=jnp.float32).reshape(B * S, HD))
        ctx = jnp.concatenate(ctx_heads, axis=-1)                    # (B*S, H)

        # Full-width output projection + residual + LN
        attn = (jnp.dot(ctx, wo_ref[l], preferred_element_type=jnp.float32)
                + hv[0:1, :])
        h1 = _ln(x + attn, hv[1:2, :], hv[2:3, :])

        # FFN. NOTE: HF BERT uses exact erf GELU; tanh-approx used here (EUP path).
        ff = jax.nn.gelu(jnp.dot(h1, w1_ref[l], preferred_element_type=jnp.float32)
                         + bf1_ref[l])
        ff = jnp.dot(ff, w2_ref[l], preferred_element_type=jnp.float32) + hv[3:4, :]
        x = _ln(h1 + ff, hv[4:5, :], hv[5:6, :])

    # ----- head: CLS token is row b*S of the resident slab -----
    cls = jnp.concatenate([x[b * S:b * S + 1, :] for b in range(B)], axis=0)  # (B, H)
    pooled = jnp.tanh(jnp.dot(cls, pw_ref[...], preferred_element_type=jnp.float32)
                      + pb_ref[...])
    # Dropout(p=0.25) -> identity at inference.
    logits = (jnp.dot(pooled, cw_ref[...], preferred_element_type=jnp.float32)
              + cb_ref[...])
    out_ref[...] = jax.nn.softmax(logits, axis=-1)     # F.softmax(..., dim=1)


def kkbox_forward_pallas(x2d, mask, params):
    def full(shape):
        return pl.BlockSpec(shape, lambda i, _n=len(shape): (0,) * _n)

    in_arrays = (x2d, mask,
                 params["wqkv"], params["bqkv"], params["wo"],
                 params["w1"], params["bf1"], params["w2"], params["hvec"],
                 params["pool_w"], params["pool_b"], params["cls_w"], params["cls_b"])
    in_specs = [full(a.shape) for a in in_arrays]

    return pl.pallas_call(
        fused_forward_kernel,
        out_shape=jax.ShapeDtypeStruct((B, NC), jnp.float32),
        grid=(1,),
        in_specs=in_specs,
        out_specs=full((B, NC)),
        compiler_params=pltpu.CompilerParams(dimension_semantics=("arbitrary",)),
    )(*in_arrays)


# --------------------------------------------------------------------------
# Parameter init (deterministic, synthetic — no checkpoint load)
# --------------------------------------------------------------------------
def init_params(key):
    keys = iter(jax.random.split(key, 16))

    def dense(shape):
        return 0.02 * jax.random.normal(next(keys), shape, jnp.float32)

    zeros_h = jnp.zeros((L, H), jnp.float32)
    ones_h = jnp.ones((L, H), jnp.float32)
    # hvec rows per layer: [bo, ln1_gamma, ln1_beta, ffn_b2, ln2_gamma, ln2_beta]
    hvec = jnp.stack([zeros_h, ones_h, zeros_h, zeros_h, ones_h, zeros_h], axis=1)

    return {
        "word_emb": dense((VOCAB, H)),
        "pos_emb": dense((S, H)),
        "type_emb": dense((2, H)),
        "emb_ln_g": jnp.ones((1, H), jnp.float32),
        "emb_ln_b": jnp.zeros((1, H), jnp.float32),
        # per-layer weights stacked along L; weights stored [in, out]
        "wqkv": dense((L, H, 3 * H)),
        "bqkv": jnp.zeros((L, 1, 3 * H), jnp.float32),
        "wo": dense((L, H, H)),
        "w1": dense((L, H, FF)),
        "bf1": jnp.zeros((L, 1, FF), jnp.float32),
        "w2": dense((L, FF, H)),
        "hvec": hvec,
        "pool_w": dense((H, H)),
        "pool_b": jnp.zeros((1, H), jnp.float32),
        "cls_w": dense((H, NC)),
        "cls_b": jnp.zeros((1, NC), jnp.float32),
    }


# --------------------------------------------------------------------------
# Full forward = KKBOXSentimentClassifier.forward(input_ids, attention_mask)
# --------------------------------------------------------------------------
def kkbox_sentiment_classifier(input_ids, attention_mask, params):
    # Embeddings (glue: gather + LayerNorm in plain JAX).
    x = (params["word_emb"][input_ids]
         + params["pos_emb"][None, :S, :]
         + params["type_emb"][None, 0:1, :])               # token_type_ids == 0
    x = _ln(x, params["emb_ln_g"][None], params["emb_ln_b"][None]).astype(jnp.float32)
    x2d = x.reshape(B * S, H)
    mask = attention_mask.astype(jnp.float32)
    # One fused kernel: encoder layers + pooler + dropout(identity) + classifier + softmax
    return kkbox_forward_pallas(x2d, mask, params)


if __name__ == "__main__":
    key = jax.random.PRNGKey(0)
    k_ids, k_par = jax.random.split(key)

    input_ids = jax.random.randint(k_ids, (B, S), 0, VOCAB, dtype=jnp.int32)
    attention_mask = jnp.ones((B, S), jnp.float32).at[1, 6:].set(0.0)  # pad tail of ex. 1

    params = init_params(k_par)
    probs = jax.jit(kkbox_sentiment_classifier)(input_ids, attention_mask, params)
    probs = jax.block_until_ready(probs)

    assert probs.shape == (B, NC)
    assert bool(jnp.all(jnp.isfinite(probs)))
    assert bool(jnp.allclose(jnp.sum(probs, axis=-1), 1.0, atol=1e-3))
    print("KERNEL_OK")
</pallas_src>

<mosaic_0001>
module attributes {stable_mosaic.version = 11 : i64} {
  func.func @fused_forward_kernel(%arg0: i32, %arg1: memref<16x32xf32, #tpu.memory_space<vmem>>, %arg2: memref<2x8xf32, #tpu.memory_space<vmem>>, %arg3: memref<2x32x96xf32, #tpu.memory_space<vmem>>, %arg4: memref<2x1x96xf32, #tpu.memory_space<vmem>>, %arg5: memref<2x32x32xf32, #tpu.memory_space<vmem>>, %arg6: memref<2x32x64xf32, #tpu.memory_space<vmem>>, %arg7: memref<2x1x64xf32, #tpu.memory_space<vmem>>, %arg8: memref<2x64x32xf32, #tpu.memory_space<vmem>>, %arg9: memref<2x6x32xf32, #tpu.memory_space<vmem>>, %arg10: memref<32x32xf32, #tpu.memory_space<vmem>>, %arg11: memref<1x32xf32, #tpu.memory_space<vmem>>, %arg12: memref<32x2xf32, #tpu.memory_space<vmem>>, %arg13: memref<1x2xf32, #tpu.memory_space<vmem>>, %arg14: memref<2x2xf32, #tpu.memory_space<vmem>>) attributes {dimension_semantics = [#tpu.dimension_semantics<arbitrary>], iteration_bounds = array<i64: 1>, scalar_prefetch = 0 : i64, scratch_operands = 0 : i64, tpu.core_type = #tpu.core_type<tc>, window_params = [{pipeline_mode = #tpu.pipeline_mode<synchronous>, transform_indices = @transform_0, window_bounds = array<i64: 16, 32>}, {pipeline_mode = #tpu.pipeline_mode<synchronous>, transform_indices = @transform_1, window_bounds = array<i64: 2, 8>}, {pipeline_mode = #tpu.pipeline_mode<synchronous>, transform_indices = @transform_2, window_bounds = array<i64: 2, 32, 96>}, {pipeline_mode = #tpu.pipeline_mode<synchronous>, transform_indices = @transform_3, window_bounds = array<i64: 2, 1, 96>}, {pipeline_mode = #tpu.pipeline_mode<synchronous>, transform_indices = @transform_4, window_bounds = array<i64: 2, 32, 32>}, {pipeline_mode = #tpu.pipeline_mode<synchronous>, transform_indices = @transform_5, window_bounds = array<i64: 2, 32, 64>}, {pipeline_mode = #tpu.pipeline_mode<synchronous>, transform_indices = @transform_6, window_bounds = array<i64: 2, 1, 64>}, {pipeline_mode = #tpu.pipeline_mode<synchronous>, transform_indices = @transform_7, window_bounds = array<i64: 2, 64, 32>}, {pipeline_mode = #tpu.pipeline_mode<synchronous>, transform_indices = @transform_8, window_bounds = array<i64: 2, 6, 32>}, {pipeline_mode = #tpu.pipeline_mode<synchronous>, transform_indices = @transform_9, window_bounds = array<i64: 32, 32>}, {pipeline_mode = #tpu.pipeline_mode<synchronous>, transform_indices = @transform_10, window_bounds = array<i64: 1, 32>}, {pipeline_mode = #tpu.pipeline_mode<synchronous>, transform_indices = @transform_11, window_bounds = array<i64: 32, 2>}, {pipeline_mode = #tpu.pipeline_mode<synchronous>, transform_indices = @transform_12, window_bounds = array<i64: 1, 2>}, {pipeline_mode = #tpu.pipeline_mode<synchronous>, transform_indices = @transform_13, window_bounds = array<i64: 2, 2>}]} {
    %c0 = arith.constant 0 : index
    %c0_0 = arith.constant 0 : index
    %0 = vector.load %arg1[%c0, %c0_0] : memref<16x32xf32, #tpu.memory_space<vmem>>, vector<16x32xf32>
    %c0_1 = arith.constant 0 : index
    %c0_2 = arith.constant 0 : index
    %1 = vector.load %arg2[%c0_1, %c0_2] : memref<2x8xf32, #tpu.memory_space<vmem>>, vector<2x8xf32>
    %cst = arith.constant 1.000000e+00 : f32
    %2 = vector.broadcast %cst : f32 to vector<2x8xf32>
    %3 = arith.subf %2, %1 : vector<2x8xf32>
    %cst_3 = arith.constant -1.000000e+09 : f32
    %4 = vector.broadcast %cst_3 : f32 to vector<2x8xf32>
    %5 = arith.mulf %3, %4 : vector<2x8xf32>
    %6 = vector.shape_cast %5 : vector<2x8xf32> to vector<2x1x8xf32>
    %c0_4 = arith.constant 0 : index
    %c0_5 = arith.constant 0 : index
    %c0_6 = arith.constant 0 : index
    %7 = vector.load %arg9[%c0_4, %c0_5, %c0_6] : memref<2x6x32xf32, #tpu.memory_space<vmem>>, vector<1x6x32xf32>
    %8 = vector.shape_cast %7 : vector<1x6x32xf32> to vector<6x32xf32>
    %c0_7 = arith.constant 0 : index
    %c0_8 = arith.constant 0 : index
    %c0_9 = arith.constant 0 : index
    %9 = vector.load %arg3[%c0_7, %c0_8, %c0_9] : memref<2x32x96xf32, #tpu.memory_space<vmem>>, vector<1x32x96xf32>
    %10 = vector.shape_cast %9 : vector<1x32x96xf32> to vector<32x96xf32>
    %cst_10 = arith.constant dense<0.000000e+00> : vector<16x96xf32>
    %11 = tpu.matmul %0, %10, %cst_10 {dimension_numbers = #tpu.dot_dimension_numbers<[1], [0], [0], [1], [0, 0, 1, 1], [], []>} : vector<16x32xf32>, vector<32x96xf32>, vector<16x96xf32> -> vector<16x96xf32>
    %c0_11 = arith.constant 0 : index
    %c0_12 = arith.constant 0 : index
    %c0_13 = arith.constant 0 : index
    %12 = vector.load %arg4[%c0_11, %c0_12, %c0_13] : memref<2x1x96xf32, #tpu.memory_space<vmem>>, vector<1x1x96xf32>
    %13 = vector.shape_cast %12 : vector<1x1x96xf32> to vector<1x96xf32>
    %14 = vector.broadcast %13 : vector<1x96xf32> to vector<16x96xf32>
    %15 = arith.addf %11, %14 : vector<16x96xf32>
    %16 = vector.extract_strided_slice %15 {offsets = [0, 0], sizes = [16, 16], strides = [1, 1]} : vector<16x96xf32> to vector<16x16xf32>
    %17 = vector.shape_cast %16 : vector<16x16xf32> to vector<2x8x16xf32>
    %18 = vector.extract_strided_slice %15 {offsets = [0, 32], sizes = [16, 16], strides = [1, 1]} : vector<16x96xf32> to vector<16x16xf32>
    %19 = vector.shape_cast %18 : vector<16x16xf32> to vector<2x8x16xf32>
    %20 = vector.extract_strided_slice %15 {offsets = [0, 64], sizes = [16, 16], strides = [1, 1]} : vector<16x96xf32> to vector<16x16xf32>
    %21 = vector.shape_cast %20 : vector<16x16xf32> to vector<2x8x16xf32>
    "tpu.trace_start"() <{level = 10 : i32, message = "bqd,bkd->bqk"}> : () -> ()
    %cst_14 = arith.constant dense<0.000000e+00> : vector<2x8x8xf32>
    %22 = tpu.matmul %17, %19, %cst_14 {dimension_numbers = #tpu.dot_dimension_numbers<[2], [2], [1], [1], [0, 0, 0, 1, 1, 1], [0], [0]>} : vector<2x8x16xf32>, vector<2x8x16xf32>, vector<2x8x8xf32> -> vector<2x8x8xf32>
    "tpu.trace_stop"() : () -> ()
    %cst_15 = arith.constant 2.500000e-01 : f32
    %23 = vector.broadcast %cst_15 : f32 to vector<2x8x8xf32>
    %24 = arith.mulf %22, %23 : vector<2x8x8xf32>
    %25 = vector.broadcast %6 : vector<2x1x8xf32> to vector<2x8x8xf32>
    %26 = arith.addf %24, %25 : vector<2x8x8xf32>
    %cst_16 = arith.constant dense<0xFF800000> : vector<2x8xf32>
    %27 = vector.multi_reduction <maximumf>, %26, %cst_16 [2] : vector<2x8x8xf32> to vector<2x8xf32>
    %28 = vector.shape_cast %27 : vector<2x8xf32> to vector<2x8x1xf32>
    %29 = vector.broadcast %28 : vector<2x8x1xf32> to vector<2x8x8xf32>
    %30 = arith.subf %26, %29 : vector<2x8x8xf32>
    %31 = math.exp %30 : vector<2x8x8xf32>
    %cst_17 = arith.constant dense<0.000000e+00> : vector<2x8xf32>
    %32 = vector.multi_reduction <add>, %31, %cst_17 [2] : vector<2x8x8xf32> to vector<2x8xf32>
    %33 = vector.shape_cast %32 : vector<2x8xf32> to vector<2x8x1xf32>
    %34 = tpu.reciprocal %33 {approx = true} : vector<2x8x1xf32> -> vector<2x8x1xf32>
    %35 = vector.broadcast %34 : vector<2x8x1xf32> to vector<2x8x8xf32>
    %36 = arith.mulf %31, %35 : vector<2x8x8xf32>
    "tpu.trace_start"() <{level = 10 : i32, message = "bqk,bkd->bqd"}> : () -> ()
    %cst_18 = arith.constant dense<0.000000e+00> : vector<2x8x16xf32>
    %37 = tpu.matmul %36, %21, %cst_18 {dimension_numbers = #tpu.dot_dimension_numbers<[2], [1], [1], [2], [0, 0, 0, 1, 1, 2], [0], [0]>} : vector<2x8x8xf32>, vector<2x8x16xf32>, vector<2x8x16xf32> -> vector<2x8x16xf32>
    "tpu.trace_stop"() : () -> ()
    %38 = vector.shape_cast %37 : vector<2x8x16xf32> to vector<16x16xf32>
    %39 = vector.extract_strided_slice %15 {offsets = [0, 16], sizes = [16, 16], strides = [1, 1]} : vector<16x96xf32> to vector<16x16xf32>
    %40 = vector.shape_cast %39 : vector<16x16xf32> to vector<2x8x16xf32>
    %41 = vector.extract_strided_slice %15 {offsets = [0, 48], sizes = [16, 16], strides = [1, 1]} : vector<16x96xf32> to vector<16x16xf32>
    %42 = vector.shape_cast %41 : vector<16x16xf32> to vector<2x8x16xf32>
    %43 = vector.extract_strided_slice %15 {offsets = [0, 80], sizes = [16, 16], strides = [1, 1]} : vector<16x96xf32> to vector<16x16xf32>
    %44 = vector.shape_cast %43 : vector<16x16xf32> to vector<2x8x16xf32>
    "tpu.trace_start"() <{level = 10 : i32, message = "bqd,bkd->bqk"}> : () -> ()
    %cst_19 = arith.constant dense<0.000000e+00> : vector<2x8x8xf32>
    %45 = tpu.matmul %40, %42, %cst_19 {dimension_numbers = #tpu.dot_dimension_numbers<[2], [2], [1], [1], [0, 0, 0, 1, 1, 1], [0], [0]>} : vector<2x8x16xf32>, vector<2x8x16xf32>, vector<2x8x8xf32> -> vector<2x8x8xf32>
    "tpu.trace_stop"() : () -> ()
    %cst_20 = arith.constant 2.500000e-01 : f32
    %46 = vector.broadcast %cst_20 : f32 to vector<2x8x8xf32>
    %47 = arith.mulf %45, %46 : vector<2x8x8xf32>
    %48 = vector.broadcast %6 : vector<2x1x8xf32> to vector<2x8x8xf32>
    %49 = arith.addf %47, %48 : vector<2x8x8xf32>
    %cst_21 = arith.constant dense<0xFF800000> : vector<2x8xf32>
    %50 = vector.multi_reduction <maximumf>, %49, %cst_21 [2] : vector<2x8x8xf32> to vector<2x8xf32>
    %51 = vector.shape_cast %50 : vector<2x8xf32> to vector<2x8x1xf32>
    %52 = vector.broadcast %51 : vector<2x8x1xf32> to vector<2x8x8xf32>
    %53 = arith.subf %49, %52 : vector<2x8x8xf32>
    %54 = math.exp %53 : vector<2x8x8xf32>
    %cst_22 = arith.constant dense<0.000000e+00> : vector<2x8xf32>
    %55 = vector.multi_reduction <add>, %54, %cst_22 [2] : vector<2x8x8xf32> to vector<2x8xf32>
    %56 = vector.shape_cast %55 : vector<2x8xf32> to vector<2x8x1xf32>
    %57 = tpu.reciprocal %56 {approx = true} : vector<2x8x1xf32> -> vector<2x8x1xf32>
    %58 = vector.broadcast %57 : vector<2x8x1xf32> to vector<2x8x8xf32>
    %59 = arith.mulf %54, %58 : vector<2x8x8xf32>
    "tpu.trace_start"() <{level = 10 : i32, message = "bqk,bkd->bqd"}> : () -> ()
    %cst_23 = arith.constant dense<0.000000e+00> : vector<2x8x16xf32>
    %60 = tpu.matmul %59, %44, %cst_23 {dimension_numbers = #tpu.dot_dimension_numbers<[2], [1], [1], [2], [0, 0, 0, 1, 1, 2], [0], [0]>} : vector<2x8x8xf32>, vector<2x8x16xf32>, vector<2x8x16xf32> -> vector<2x8x16xf32>
    "tpu.trace_stop"() : () -> ()
    %61 = vector.shape_cast %60 : vector<2x8x16xf32> to vector<16x16xf32>
    %62 = tpu.concatenate %38, %61 in 1 : vector<16x16xf32>, vector<16x16xf32> -> vector<16x32xf32>
    %c0_24 = arith.constant 0 : index
    %c0_25 = arith.constant 0 : index
    %c0_26 = arith.constant 0 : index
    %63 = vector.load %arg5[%c0_24, %c0_25, %c0_26] : memref<2x32x32xf32, #tpu.memory_space<vmem>>, vector<1x32x32xf32>
    %64 = vector.shape_cast %63 : vector<1x32x32xf32> to vector<32x32xf32>
    %cst_27 = arith.constant dense<0.000000e+00> : vector<16x32xf32>
    %65 = tpu.matmul %62, %64, %cst_27 {dimension_numbers = #tpu.dot_dimension_numbers<[1], [0], [0], [1], [0, 0, 1, 1], [], []>} : vector<16x32xf32>, vector<32x32xf32>, vector<16x32xf32> -> vector<16x32xf32>
    %66 = vector.extract_strided_slice %8 {offsets = [0, 0], sizes = [1, 32], strides = [1, 1]} : vector<6x32xf32> to vector<1x32xf32>
    %67 = vector.broadcast %66 : vector<1x32xf32> to vector<16x32xf32>
    %68 = arith.addf %65, %67 : vector<16x32xf32>
    %69 = arith.addf %0, %68 : vector<16x32xf32>
    %70 = vector.extract_strided_slice %8 {offsets = [1, 0], sizes = [1, 32], strides = [1, 1]} : vector<6x32xf32> to vector<1x32xf32>
    %71 = vector.extract_strided_slice %8 {offsets = [2, 0], sizes = [1, 32], strides = [1, 1]} : vector<6x32xf32> to vector<1x32xf32>
    %cst_28 = arith.constant dense<0.000000e+00> : vector<16xf32>
    %72 = vector.multi_reduction <add>, %69, %cst_28 [1] : vector<16x32xf32> to vector<16xf32>
    %73 = vector.shape_cast %72 : vector<16xf32> to vector<16x1xf32>
    %cst_29 = arith.constant 3.200000e+01 : f32
    %74 = vector.broadcast %cst_29 : f32 to vector<16x1xf32>
    %75 = arith.divf %73, %74 : vector<16x1xf32>
    %76 = vector.broadcast %75 : vector<16x1xf32> to vector<16x32xf32>
    %77 = arith.subf %69, %76 : vector<16x32xf32>
    %78 = arith.mulf %77, %77 : vector<16x32xf32>
    %cst_30 = arith.constant dense<0.000000e+00> : vector<16xf32>
    %79 = vector.multi_reduction <add>, %78, %cst_30 [1] : vector<16x32xf32> to vector<16xf32>
    %80 = vector.shape_cast %79 : vector<16xf32> to vector<16x1xf32>
    %cst_31 = arith.constant 3.200000e+01 : f32
    %81 = vector.broadcast %cst_31 : f32 to vector<16x1xf32>
    %82 = arith.divf %80, %81 : vector<16x1xf32>
    %83 = vector.broadcast %75 : vector<16x1xf32> to vector<16x32xf32>
    %84 = arith.subf %69, %83 : vector<16x32xf32>
    %cst_32 = arith.constant 9.99999996E-13 : f32
    %85 = vector.broadcast %cst_32 : f32 to vector<16x1xf32>
    %86 = arith.addf %82, %85 : vector<16x1xf32>
    %87 = math.rsqrt %86 : vector<16x1xf32>
    %88 = vector.broadcast %87 : vector<16x1xf32> to vector<16x32xf32>
    %89 = arith.mulf %84, %88 : vector<16x32xf32>
    %90 = vector.broadcast %70 : vector<1x32xf32> to vector<16x32xf32>
    %91 = arith.mulf %89, %90 : vector<16x32xf32>
    %92 = vector.broadcast %71 : vector<1x32xf32> to vector<16x32xf32>
    %93 = arith.addf %91, %92 : vector<16x32xf32>
    %c0_33 = arith.constant 0 : index
    %c0_34 = arith.constant 0 : index
    %c0_35 = arith.constant 0 : index
    %94 = vector.load %arg6[%c0_33, %c0_34, %c0_35] : memref<2x32x64xf32, #tpu.memory_space<vmem>>, vector<1x32x64xf32>
    %95 = vector.shape_cast %94 : vector<1x32x64xf32> to vector<32x64xf32>
    %cst_36 = arith.constant dense<0.000000e+00> : vector<16x64xf32>
    %96 = tpu.matmul %93, %95, %cst_36 {dimension_numbers = #tpu.dot_dimension_numbers<[1], [0], [0], [1], [0, 0, 1, 1], [], []>} : vector<16x32xf32>, vector<32x64xf32>, vector<16x64xf32> -> vector<16x64xf32>
    %c0_37 = arith.constant 0 : index
    %c0_38 = arith.constant 0 : index
    %c0_39 = arith.constant 0 : index
    %97 = vector.load %arg7[%c0_37, %c0_38, %c0_39] : memref<2x1x64xf32, #tpu.memory_space<vmem>>, vector<1x1x64xf32>
    %98 = vector.shape_cast %97 : vector<1x1x64xf32> to vector<1x64xf32>
    %99 = vector.broadcast %98 : vector<1x64xf32> to vector<16x64xf32>
    %100 = arith.addf %96, %99 : vector<16x64xf32>
    %101 = arith.mulf %100, %100 : vector<16x64xf32>
    %102 = arith.mulf %100, %101 : vector<16x64xf32>
    %cst_40 = arith.constant 4.471500e-02 : f32
    %103 = vector.broadcast %cst_40 : f32 to vector<16x64xf32>
    %104 = arith.mulf %103, %102 : vector<16x64xf32>
    %105 = arith.addf %100, %104 : vector<16x64xf32>
    %cst_41 = arith.constant 0.797884583 : f32
    %106 = vector.broadcast %cst_41 : f32 to vector<16x64xf32>
    %107 = arith.mulf %106, %105 : vector<16x64xf32>
    %108 = math.tanh %107 : vector<16x64xf32>
    %cst_42 = arith.constant 1.000000e+00 : f32
    %109 = vector.broadcast %cst_42 : f32 to vector<16x64xf32>
    %110 = arith.addf %109, %108 : vector<16x64xf32>
    %cst_43 = arith.constant 5.000000e-01 : f32
    %111 = vector.broadcast %cst_43 : f32 to vector<16x64xf32>
    %112 = arith.mulf %111, %110 : vector<16x64xf32>
    %113 = arith.mulf %100, %112 : vector<16x64xf32>
    %c0_44 = arith.constant 0 : index
    %c0_45 = arith.constant 0 : index
    %c0_46 = arith.constant 0 : index
    %114 = vector.load %arg8[%c0_44, %c0_45, %c0_46] : memref<2x64x32xf32, #tpu.memory_space<vmem>>, vector<1x64x32xf32>
    %115 = vector.shape_cast %114 : vector<1x64x32xf32> to vector<64x32xf32>
    %cst_47 = arith.constant dense<0.000000e+00> : vector<16x32xf32>
    %116 = tpu.matmul %113, %115, %cst_47 {dimension_numbers = #tpu.dot_dimension_numbers<[1], [0], [0], [1], [0, 0, 1, 1], [], []>} : vector<16x64xf32>, vector<64x32xf32>, vector<16x32xf32> -> vector<16x32xf32>
    %117 = vector.extract_strided_slice %8 {offsets = [3, 0], sizes = [1, 32], strides = [1, 1]} : vector<6x32xf32> to vector<1x32xf32>
    %118 = vector.broadcast %117 : vector<1x32xf32> to vector<16x32xf32>
    %119 = arith.addf %116, %118 : vector<16x32xf32>
    %120 = arith.addf %93, %119 : vector<16x32xf32>
    %121 = vector.extract_strided_slice %8 {offsets = [4, 0], sizes = [1, 32], strides = [1, 1]} : vector<6x32xf32> to vector<1x32xf32>
    %122 = vector.extract_strided_slice %8 {offsets = [5, 0], sizes = [1, 32], strides = [1, 1]} : vector<6x32xf32> to vector<1x32xf32>
    %cst_48 = arith.constant dense<0.000000e+00> : vector<16xf32>
    %123 = vector.multi_reduction <add>, %120, %cst_48 [1] : vector<16x32xf32> to vector<16xf32>
    %124 = vector.shape_cast %123 : vector<16xf32> to vector<16x1xf32>
    %cst_49 = arith.constant 3.200000e+01 : f32
    %125 = vector.broadcast %cst_49 : f32 to vector<16x1xf32>
    %126 = arith.divf %124, %125 : vector<16x1xf32>
    %127 = vector.broadcast %126 : vector<16x1xf32> to vector<16x32xf32>
    %128 = arith.subf %120, %127 : vector<16x32xf32>
    %129 = arith.mulf %128, %128 : vector<16x32xf32>
    %cst_50 = arith.constant dense<0.000000e+00> : vector<16xf32>
    %130 = vector.multi_reduction <add>, %129, %cst_50 [1] : vector<16x32xf32> to vector<16xf32>
    %131 = vector.shape_cast %130 : vector<16xf32> to vector<16x1xf32>
    %cst_51 = arith.constant 3.200000e+01 : f32
    %132 = vector.broadcast %cst_51 : f32 to vector<16x1xf32>
    %133 = arith.divf %131, %132 : vector<16x1xf32>
    %134 = vector.broadcast %126 : vector<16x1xf32> to vector<16x32xf32>
    %135 = arith.subf %120, %134 : vector<16x32xf32>
    %cst_52 = arith.constant 9.99999996E-13 : f32
    %136 = vector.broadcast %cst_52 : f32 to vector<16x1xf32>
    %137 = arith.addf %133, %136 : vector<16x1xf32>
    %138 = math.rsqrt %137 : vector<16x1xf32>
    %139 = vector.broadcast %138 : vector<16x1xf32> to vector<16x32xf32>
    %140 = arith.mulf %135, %139 : vector<16x32xf32>
    %141 = vector.broadcast %121 : vector<1x32xf32> to vector<16x32xf32>
    %142 = arith.mulf %140, %141 : vector<16x32xf32>
    %143 = vector.broadcast %122 : vector<1x32xf32> to vector<16x32xf32>
    %144 = arith.addf %142, %143 : vector<16x32xf32>
    %c1 = arith.constant 1 : index
    %c0_53 = arith.constant 0 : index
    %c0_54 = arith.constant 0 : index
    %145 = vector.load %arg9[%c1, %c0_53, %c0_54] : memref<2x6x32xf32, #tpu.memory_space<vmem>>, vector<1x6x32xf32>
    %146 = vector.shape_cast %145 : vector<1x6x32xf32> to vector<6x32xf32>
    %c1_55 = arith.constant 1 : index
    %c0_56 = arith.constant 0 : index
    %c0_57 = arith.constant 0 : index
    %147 = vector.load %arg3[%c1_55, %c0_56, %c0_57] : memref<2x32x96xf32, #tpu.memory_space<vmem>>, vector<1x32x96xf32>
    %148 = vector.shape_cast %147 : vector<1x32x96xf32> to vector<32x96xf32>
    %cst_58 = arith.constant dense<0.000000e+00> : vector<16x96xf32>
    %149 = tpu.matmul %144, %148, %cst_58 {dimension_numbers = #tpu.dot_dimension_numbers<[1], [0], [0], [1], [0, 0, 1, 1], [], []>} : vector<16x32xf32>, vector<32x96xf32>, vector<16x96xf32> -> vector<16x96xf32>
    %c1_59 = arith.constant 1 : index
    %c0_60 = arith.constant 0 : index
    %c0_61 = arith.constant 0 : index
    %150 = vector.load %arg4[%c1_59, %c0_60, %c0_61] : memref<2x1x96xf32, #tpu.memory_space<vmem>>, vector<1x1x96xf32>
    %151 = vector.shape_cast %150 : vector<1x1x96xf32> to vector<1x96xf32>
    %152 = vector.broadcast %151 : vector<1x96xf32> to vector<16x96xf32>
    %153 = arith.addf %149, %152 : vector<16x96xf32>
    %154 = vector.extract_strided_slice %153 {offsets = [0, 0], sizes = [16, 16], strides = [1, 1]} : vector<16x96xf32> to vector<16x16xf32>
    %155 = vector.shape_cast %154 : vector<16x16xf32> to vector<2x8x16xf32>
    %156 = vector.extract_strided_slice %153 {offsets = [0, 32], sizes = [16, 16], strides = [1, 1]} : vector<16x96xf32> to vector<16x16xf32>
    %157 = vector.shape_cast %156 : vector<16x16xf32> to vector<2x8x16xf32>
    %158 = vector.extract_strided_slice %153 {offsets = [0, 64], sizes = [16, 16], strides = [1, 1]} : vector<16x96xf32> to vector<16x16xf32>
    %159 = vector.shape_cast %158 : vector<16x16xf32> to vector<2x8x16xf32>
    "tpu.trace_start"() <{level = 10 : i32, message = "bqd,bkd->bqk"}> : () -> ()
    %cst_62 = arith.constant dense<0.000000e+00> : vector<2x8x8xf32>
    %160 = tpu.matmul %155, %157, %cst_62 {dimension_numbers = #tpu.dot_dimension_numbers<[2], [2], [1], [1], [0, 0, 0, 1, 1, 1], [0], [0]>} : vector<2x8x16xf32>, vector<2x8x16xf32>, vector<2x8x8xf32> -> vector<2x8x8xf32>
    "tpu.trace_stop"() : () -> ()
    %cst_63 = arith.constant 2.500000e-01 : f32
    %161 = vector.broadcast %cst_63 : f32 to vector<2x8x8xf32>
    %162 = arith.mulf %160, %161 : vector<2x8x8xf32>
    %163 = vector.broadcast %6 : vector<2x1x8xf32> to vector<2x8x8xf32>
    %164 = arith.addf %162, %163 : vector<2x8x8xf32>
    %cst_64 = arith.constant dense<0xFF800000> : vector<2x8xf32>
    %165 = vector.multi_reduction <maximumf>, %164, %cst_64 [2] : vector<2x8x8xf32> to vector<2x8xf32>
    %166 = vector.shape_cast %165 : vector<2x8xf32> to vector<2x8x1xf32>
    %167 = vector.broadcast %166 : vector<2x8x1xf32> to vector<2x8x8xf32>
    %168 = arith.subf %164, %167 : vector<2x8x8xf32>
    %169 = math.exp %168 : vector<2x8x8xf32>
    %cst_65 = arith.constant dense<0.000000e+00> : vector<2x8xf32>
    %170 = vector.multi_reduction <add>, %169, %cst_65 [2] : vector<2x8x8xf32> to vector<2x8xf32>
    %171 = vector.shape_cast %170 : vector<2x8xf32> to vector<2x8x1xf32>
    %172 = tpu.reciprocal %171 {approx = true} : vector<2x8x1xf32> -> vector<2x8x1xf32>
    %173 = vector.broadcast %172 : vector<2x8x1xf32> to vector<2x8x8xf32>
    %174 = arith.mulf %169, %173 : vector<2x8x8xf32>
    "tpu.trace_start"() <{level = 10 : i32, message = "bqk,bkd->bqd"}> : () -> ()
    %cst_66 = arith.constant dense<0.000000e+00> : vector<2x8x16xf32>
    %175 = tpu.matmul %174, %159, %cst_66 {dimension_numbers = #tpu.dot_dimension_numbers<[2], [1], [1], [2], [0, 0, 0, 1, 1, 2], [0], [0]>} : vector<2x8x8xf32>, vector<2x8x16xf32>, vector<2x8x16xf32> -> vector<2x8x16xf32>
    "tpu.trace_stop"() : () -> ()
    %176 = vector.shape_cast %175 : vector<2x8x16xf32> to vector<16x16xf32>
    %177 = vector.extract_strided_slice %153 {offsets = [0, 16], sizes = [16, 16], strides = [1, 1]} : vector<16x96xf32> to vector<16x16xf32>
    %178 = vector.shape_cast %177 : vector<16x16xf32> to vector<2x8x16xf32>
    %179 = vector.extract_strided_slice %153 {offsets = [0, 48], sizes = [16, 16], strides = [1, 1]} : vector<16x96xf32> to vector<16x16xf32>
    %180 = vector.shape_cast %179 : vector<16x16xf32> to vector<2x8x16xf32>
    %181 = vector.extract_strided_slice %153 {offsets = [0, 80], sizes = [16, 16], strides = [1, 1]} : vector<16x96xf32> to vector<16x16xf32>
    %182 = vector.shape_cast %181 : vector<16x16xf32> to vector<2x8x16xf32>
    "tpu.trace_start"() <{level = 10 : i32, message = "bqd,bkd->bqk"}> : () -> ()
    %cst_67 = arith.constant dense<0.000000e+00> : vector<2x8x8xf32>
    %183 = tpu.matmul %178, %180, %cst_67 {dimension_numbers = #tpu.dot_dimension_numbers<[2], [2], [1], [1], [0, 0, 0, 1, 1, 1], [0], [0]>} : vector<2x8x16xf32>, vector<2x8x16xf32>, vector<2x8x8xf32> -> vector<2x8x8xf32>
    "tpu.trace_stop"() : () -> ()
    %cst_68 = arith.constant 2.500000e-01 : f32
    %184 = vector.broadcast %cst_68 : f32 to vector<2x8x8xf32>
    %185 = arith.mulf %183, %184 : vector<2x8x8xf32>
    %186 = vector.broadcast %6 : vector<2x1x8xf32> to vector<2x8x8xf32>
    %187 = arith.addf %185, %186 : vector<2x8x8xf32>
    %cst_69 = arith.constant dense<0xFF800000> : vector<2x8xf32>
    %188 = vector.multi_reduction <maximumf>, %187, %cst_69 [2] : vector<2x8x8xf32> to vector<2x8xf32>
    %189 = vector.shape_cast %188 : vector<2x8xf32> to vector<2x8x1xf32>
    %190 = vector.broadcast %189 : vector<2x8x1xf32> to vector<2x8x8xf32>
    %191 = arith.subf %187, %190 : vector<2x8x8xf32>
    %192 = math.exp %191 : vector<2x8x8xf32>
    %cst_70 = arith.constant dense<0.000000e+00> : vector<2x8xf32>
    %193 = vector.multi_reduction <add>, %192, %cst_70 [2] : vector<2x8x8xf32> to vector<2x8xf32>
    %194 = vector.shape_cast %193 : vector<2x8xf32> to vector<2x8x1xf32>
    %195 = tpu.reciprocal %194 {approx = true} : vector<2x8x1xf32> -> vector<2x8x1xf32>
    %196 = vector.broadcast %195 : vector<2x8x1xf32> to vector<2x8x8xf32>
    %197 = arith.mulf %192, %196 : vector<2x8x8xf32>
    "tpu.trace_start"() <{level = 10 : i32, message = "bqk,bkd->bqd"}> : () -> ()
    %cst_71 = arith.constant dense<0.000000e+00> : vector<2x8x16xf32>
    %198 = tpu.matmul %197, %182, %cst_71 {dimension_numbers = #tpu.dot_dimension_numbers<[2], [1], [1], [2], [0, 0, 0, 1, 1, 2], [0], [0]>} : vector<2x8x8xf32>, vector<2x8x16xf32>, vector<2x8x16xf32> -> vector<2x8x16xf32>
    "tpu.trace_stop"() : () -> ()
    %199 = vector.shape_cast %198 : vector<2x8x16xf32> to vector<16x16xf32>
    %200 = tpu.concatenate %176, %199 in 1 : vector<16x16xf32>, vector<16x16xf32> -> vector<16x32xf32>
    %c1_72 = arith.constant 1 : index
    %c0_73 = arith.constant 0 : index
    %c0_74 = arith.constant 0 : index
    %201 = vector.load %arg5[%c1_72, %c0_73, %c0_74] : memref<2x32x32xf32, #tpu.memory_space<vmem>>, vector<1x32x32xf32>
    %202 = vector.shape_cast %201 : vector<1x32x32xf32> to vector<32x32xf32>
    %cst_75 = arith.constant dense<0.000000e+00> : vector<16x32xf32>
    %203 = tpu.matmul %200, %202, %cst_75 {dimension_numbers = #tpu.dot_dimension_numbers<[1], [0], [0], [1], [0, 0, 1, 1], [], []>} : vector<16x32xf32>, vector<32x32xf32>, vector<16x32xf32> -> vector<16x32xf32>
    %204 = vector.extract_strided_slice %146 {offsets = [0, 0], sizes = [1, 32], strides = [1, 1]} : vector<6x32xf32> to vector<1x32xf32>
    %205 = vector.broadcast %204 : vector<1x32xf32> to vector<16x32xf32>
    %206 = arith.addf %203, %205 : vector<16x32xf32>
    %207 = arith.addf %144, %206 : vector<16x32xf32>
    %208 = vector.extract_strided_slice %146 {offsets = [1, 0], sizes = [1, 32], strides = [1, 1]} : vector<6x32xf32> to vector<1x32xf32>
    %209 = vector.extract_strided_slice %146 {offsets = [2, 0], sizes = [1, 32], strides = [1, 1]} : vector<6x32xf32> to vector<1x32xf32>
    %cst_76 = arith.constant dense<0.000000e+00> : vector<16xf32>
    %210 = vector.multi_reduction <add>, %207, %cst_76 [1] : vector<16x32xf32> to vector<16xf32>
    %211 = vector.shape_cast %210 : vector<16xf32> to vector<16x1xf32>
    %cst_77 = arith.constant 3.200000e+01 : f32
    %212 = vector.broadcast %cst_77 : f32 to vector<16x1xf32>
    %213 = arith.divf %211, %212 : vector<16x1xf32>
    %214 = vector.broadcast %213 : vector<16x1xf32> to vector<16x32xf32>
    %215 = arith.subf %207, %214 : vector<16x32xf32>
    %216 = arith.mulf %215, %215 : vector<16x32xf32>
    %cst_78 = arith.constant dense<0.000000e+00> : vector<16xf32>
    %217 = vector.multi_reduction <add>, %216, %cst_78 [1] : vector<16x32xf32> to vector<16xf32>
    %218 = vector.shape_cast %217 : vector<16xf32> to vector<16x1xf32>
    %cst_79 = arith.constant 3.200000e+01 : f32
    %219 = vector.broadcast %cst_79 : f32 to vector<16x1xf32>
    %220 = arith.divf %218, %219 : vector<16x1xf32>
    %221 = vector.broadcast %213 : vector<16x1xf32> to vector<16x32xf32>
    %222 = arith.subf %207, %221 : vector<16x32xf32>
    %cst_80 = arith.constant 9.99999996E-13 : f32
    %223 = vector.broadcast %cst_80 : f32 to vector<16x1xf32>
    %224 = arith.addf %220, %223 : vector<16x1xf32>
    %225 = math.rsqrt %224 : vector<16x1xf32>
    %226 = vector.broadcast %225 : vector<16x1xf32> to vector<16x32xf32>
    %227 = arith.mulf %222, %226 : vector<16x32xf32>
    %228 = vector.broadcast %208 : vector<1x32xf32> to vector<16x32xf32>
    %229 = arith.mulf %227, %228 : vector<16x32xf32>
    %230 = vector.broadcast %209 : vector<1x32xf32> to vector<16x32xf32>
    %231 = arith.addf %229, %230 : vector<16x32xf32>
    %c1_81 = arith.constant 1 : index
    %c0_82 = arith.constant 0 : index
    %c0_83 = arith.constant 0 : index
    %232 = vector.load %arg6[%c1_81, %c0_82, %c0_83] : memref<2x32x64xf32, #tpu.memory_space<vmem>>, vector<1x32x64xf32>
    %233 = vector.shape_cast %232 : vector<1x32x64xf32> to vector<32x64xf32>
    %cst_84 = arith.constant dense<0.000000e+00> : vector<16x64xf32>
    %234 = tpu.matmul %231, %233, %cst_84 {dimension_numbers = #tpu.dot_dimension_numbers<[1], [0], [0], [1], [0, 0, 1, 1], [], []>} : vector<16x32xf32>, vector<32x64xf32>, vector<16x64xf32> -> vector<16x64xf32>
    %c1_85 = arith.constant 1 : index
    %c0_86 = arith.constant 0 : index
    %c0_87 = arith.constant 0 : index
    %235 = vector.load %arg7[%c1_85, %c0_86, %c0_87] : memref<2x1x64xf32, #tpu.memory_space<vmem>>, vector<1x1x64xf32>
    %236 = vector.shape_cast %235 : vector<1x1x64xf32> to vector<1x64xf32>
    %237 = vector.broadcast %236 : vector<1x64xf32> to vector<16x64xf32>
    %238 = arith.addf %234, %237 : vector<16x64xf32>
    %239 = arith.mulf %238, %238 : vector<16x64xf32>
    %240 = arith.mulf %238, %239 : vector<16x64xf32>
    %cst_88 = arith.constant 4.471500e-02 : f32
    %241 = vector.broadcast %cst_88 : f32 to vector<16x64xf32>
    %242 = arith.mulf %241, %240 : vector<16x64xf32>
    %243 = arith.addf %238, %242 : vector<16x64xf32>
    %cst_89 = arith.constant 0.797884583 : f32
    %244 = vector.broadcast %cst_89 : f32 to vector<16x64xf32>
    %245 = arith.mulf %244, %243 : vector<16x64xf32>
    %246 = math.tanh %245 : vector<16x64xf32>
    %cst_90 = arith.constant 1.000000e+00 : f32
    %247 = vector.broadcast %cst_90 : f32 to vector<16x64xf32>
    %248 = arith.addf %247, %246 : vector<16x64xf32>
    %cst_91 = arith.constant 5.000000e-01 : f32
    %249 = vector.broadcast %cst_91 : f32 to vector<16x64xf32>
    %250 = arith.mulf %249, %248 : vector<16x64xf32>
    %251 = arith.mulf %238, %250 : vector<16x64xf32>
    %c1_92 = arith.constant 1 : index
    %c0_93 = arith.constant 0 : index
    %c0_94 = arith.constant 0 : index
    %252 = vector.load %arg8[%c1_92, %c0_93, %c0_94] : memref<2x64x32xf32, #tpu.memory_space<vmem>>, vector<1x64x32xf32>
    %253 = vector.shape_cast %252 : vector<1x64x32xf32> to vector<64x32xf32>
    %cst_95 = arith.constant dense<0.000000e+00> : vector<16x32xf32>
    %254 = tpu.matmul %251, %253, %cst_95 {dimension_numbers = #tpu.dot_dimension_numbers<[1], [0], [0], [1], [0, 0, 1, 1], [], []>} : vector<16x64xf32>, vector<64x32xf32>, vector<16x32xf32> -> vector<16x32xf32>
    %255 = vector.extract_strided_slice %146 {offsets = [3, 0], sizes = [1, 32], strides = [1, 1]} : vector<6x32xf32> to vector<1x32xf32>
    %256 = vector.broadcast %255 : vector<1x32xf32> to vector<16x32xf32>
    %257 = arith.addf %254, %256 : vector<16x32xf32>
    %258 = arith.addf %231, %257 : vector<16x32xf32>
    %259 = vector.extract_strided_slice %146 {offsets = [4, 0], sizes = [1, 32], strides = [1, 1]} : vector<6x32xf32> to vector<1x32xf32>
    %260 = vector.extract_strided_slice %146 {offsets = [5, 0], sizes = [1, 32], strides = [1, 1]} : vector<6x32xf32> to vector<1x32xf32>
    %cst_96 = arith.constant dense<0.000000e+00> : vector<16xf32>
    %261 = vector.multi_reduction <add>, %258, %cst_96 [1] : vector<16x32xf32> to vector<16xf32>
    %262 = vector.shape_cast %261 : vector<16xf32> to vector<16x1xf32>
    %cst_97 = arith.constant 3.200000e+01 : f32
    %263 = vector.broadcast %cst_97 : f32 to vector<16x1xf32>
    %264 = arith.divf %262, %263 : vector<16x1xf32>
    %265 = vector.broadcast %264 : vector<16x1xf32> to vector<16x32xf32>
    %266 = arith.subf %258, %265 : vector<16x32xf32>
    %267 = arith.mulf %266, %266 : vector<16x32xf32>
    %cst_98 = arith.constant dense<0.000000e+00> : vector<16xf32>
    %268 = vector.multi_reduction <add>, %267, %cst_98 [1] : vector<16x32xf32> to vector<16xf32>
    %269 = vector.shape_cast %268 : vector<16xf32> to vector<16x1xf32>
    %cst_99 = arith.constant 3.200000e+01 : f32
    %270 = vector.broadcast %cst_99 : f32 to vector<16x1xf32>
    %271 = arith.divf %269, %270 : vector<16x1xf32>
    %272 = vector.broadcast %264 : vector<16x1xf32> to vector<16x32xf32>
    %273 = arith.subf %258, %272 : vector<16x32xf32>
    %cst_100 = arith.constant 9.99999996E-13 : f32
    %274 = vector.broadcast %cst_100 : f32 to vector<16x1xf32>
    %275 = arith.addf %271, %274 : vector<16x1xf32>
    %276 = math.rsqrt %275 : vector<16x1xf32>
    %277 = vector.broadcast %276 : vector<16x1xf32> to vector<16x32xf32>
    %278 = arith.mulf %273, %277 : vector<16x32xf32>
    %279 = vector.broadcast %259 : vector<1x32xf32> to vector<16x32xf32>
    %280 = arith.mulf %278, %279 : vector<16x32xf32>
    %281 = vector.broadcast %260 : vector<1x32xf32> to vector<16x32xf32>
    %282 = arith.addf %280, %281 : vector<16x32xf32>
    %283 = vector.extract_strided_slice %282 {offsets = [0, 0], sizes = [1, 32], strides = [1, 1]} : vector<16x32xf32> to vector<1x32xf32>
    %284 = vector.extract_strided_slice %282 {offsets = [8, 0], sizes = [1, 32], strides = [1, 1]} : vector<16x32xf32> to vector<1x32xf32>
    %285 = tpu.concatenate %283, %284 in 0 : vector<1x32xf32>, vector<1x32xf32> -> vector<2x32xf32>
    %c0_101 = arith.constant 0 : index
    %c0_102 = arith.constant 0 : index
    %286 = vector.load %arg10[%c0_101, %c0_102] : memref<32x32xf32, #tpu.memory_space<vmem>>, vector<32x32xf32>
    %cst_103 = arith.constant dense<0.000000e+00> : vector<2x32xf32>
    %287 = tpu.matmul %285, %286, %cst_103 {dimension_numbers = #tpu.dot_dimension_numbers<[1], [0], [0], [1], [0, 0, 1, 1], [], []>} : vector<2x32xf32>, vector<32x32xf32>, vector<2x32xf32> -> vector<2x32xf32>
    %c0_104 = arith.constant 0 : index
    %c0_105 = arith.constant 0 : index
    %288 = vector.load %arg11[%c0_104, %c0_105] : memref<1x32xf32, #tpu.memory_space<vmem>>, vector<1x32xf32>
    %289 = vector.broadcast %288 : vector<1x32xf32> to vector<2x32xf32>
    %290 = arith.addf %287, %289 : vector<2x32xf32>
    %291 = math.tanh %290 : vector<2x32xf32>
    %c0_106 = arith.constant 0 : index
    %c0_107 = arith.constant 0 : index
    %292 = vector.load %arg12[%c0_106, %c0_107] : memref<32x2xf32, #tpu.memory_space<vmem>>, vector<32x2xf32>
    %cst_108 = arith.constant dense<0.000000e+00> : vector<2x2xf32>
    %293 = tpu.matmul %291, %292, %cst_108 {dimension_numbers = #tpu.dot_dimension_numbers<[1], [0], [0], [1], [0, 0, 1, 1], [], []>} : vector<2x32xf32>, vector<32x2xf32>, vector<2x2xf32> -> vector<2x2xf32>
    %c0_109 = arith.constant 0 : index
    %c0_110 = arith.constant 0 : index
    %294 = vector.load %arg13[%c0_109, %c0_110] : memref<1x2xf32, #tpu.memory_space<vmem>>, vector<1x2xf32>
    %295 = vector.broadcast %294 : vector<1x2xf32> to vector<2x2xf32>
    %296 = arith.addf %293, %295 : vector<2x2xf32>
    %cst_111 = arith.constant dense<0xFF800000> : vector<2xf32>
    %297 = vector.multi_reduction <maximumf>, %296, %cst_111 [1] : vector<2x2xf32> to vector<2xf32>
    %cst_112 = arith.constant 0xFF800000 : f32
    %298 = vector.broadcast %cst_112 : f32 to vector<2xf32>
    %299 = arith.maximumf %298, %297 : vector<2xf32>
    %300 = vector.shape_cast %299 : vector<2xf32> to vector<2x1xf32>
    %301 = vector.broadcast %300 : vector<2x1xf32> to vector<2x2xf32>
    %302 = arith.subf %296, %301 : vector<2x2xf32>
    %303 = math.exp %302 : vector<2x2xf32>
    %cst_113 = arith.constant dense<0.000000e+00> : vector<2xf32>
    %304 = vector.multi_reduction <add>, %303, %cst_113 [1] : vector<2x2xf32> to vector<2xf32>
    %305 = vector.shape_cast %304 : vector<2xf32> to vector<2x1xf32>
    %306 = vector.broadcast %305 : vector<2x1xf32> to vector<2x2xf32>
    %307 = arith.divf %303, %306 : vector<2x2xf32>
    %c0_114 = arith.constant 0 : index
    %c0_115 = arith.constant 0 : index
    %308 = vector.load %arg14[%c0_114, %c0_115] : memref<2x2xf32, #tpu.memory_space<vmem>>, vector<2x2xf32>
    tpu.vector_store %arg14[%c0_114, %c0_115], %307 {strides = array<i32>} : memref<2x2xf32, #tpu.memory_space<vmem>>, vector<2x2xf32>,
    return
  }
  func.func @transform_0(%arg0: i32) -> (i32, i32) {
    %c0_i32 = arith.constant 0 : i32
    %c0_i32_0 = arith.constant 0 : i32
    %c0_i32_1 = arith.constant 0 : i32
    return %c0_i32, %c0_i32_0 : i32, i32
  }
  func.func @transform_1(%arg0: i32) -> (i32, i32) {
    %c0_i32 = arith.constant 0 : i32
    %c0_i32_0 = arith.constant 0 : i32
    %c0_i32_1 = arith.constant 0 : i32
    return %c0_i32, %c0_i32_0 : i32, i32
  }
  func.func @transform_2(%arg0: i32) -> (i32, i32, i32) {
    %c0_i32 = arith.constant 0 : i32
    %c0_i32_0 = arith.constant 0 : i32
    %c0_i32_1 = arith.constant 0 : i32
    %c0_i32_2 = arith.constant 0 : i32
    return %c0_i32, %c0_i32_0, %c0_i32_1 : i32, i32, i32
  }
  func.func @transform_3(%arg0: i32) -> (i32, i32, i32) {
    %c0_i32 = arith.constant 0 : i32
    %c0_i32_0 = arith.constant 0 : i32
    %c0_i32_1 = arith.constant 0 : i32
    %c0_i32_2 = arith.constant 0 : i32
    return %c0_i32, %c0_i32_0, %c0_i32_1 : i32, i32, i32
  }
  func.func @transform_4(%arg0: i32) -> (i32, i32, i32) {
    %c0_i32 = arith.constant 0 : i32
    %c0_i32_0 = arith.constant 0 : i32
    %c0_i32_1 = arith.constant 0 : i32
    %c0_i32_2 = arith.constant 0 : i32
    return %c0_i32, %c0_i32_0, %c0_i32_1 : i32, i32, i32
  }
  func.func @transform_5(%arg0: i32) -> (i32, i32, i32) {
    %c0_i32 = arith.constant 0 : i32
    %c0_i32_0 = arith.constant 0 : i32
    %c0_i32_1 = arith.constant 0 : i32
    %c0_i32_2 = arith.constant 0 : i32
    return %c0_i32, %c0_i32_0, %c0_i32_1 : i32, i32, i32
  }
  func.func @transform_6(%arg0: i32) -> (i32, i32, i32) {
    %c0_i32 = arith.constant 0 : i32
    %c0_i32_0 = arith.constant 0 : i32
    %c0_i32_1 = arith.constant 0 : i32
    %c0_i32_2 = arith.constant 0 : i32
    return %c0_i32, %c0_i32_0, %c0_i32_1 : i32, i32, i32
  }
  func.func @transform_7(%arg0: i32) -> (i32, i32, i32) {
    %c0_i32 = arith.constant 0 : i32
    %c0_i32_0 = arith.constant 0 : i32
    %c0_i32_1 = arith.constant 0 : i32
    %c0_i32_2 = arith.constant 0 : i32
    return %c0_i32, %c0_i32_0, %c0_i32_1 : i32, i32, i32
  }
  func.func @transform_8(%arg0: i32) -> (i32, i32, i32) {
    %c0_i32 = arith.constant 0 : i32
    %c0_i32_0 = arith.constant 0 : i32
    %c0_i32_1 = arith.constant 0 : i32
    %c0_i32_2 = arith.constant 0 : i32
    return %c0_i32, %c0_i32_0, %c0_i32_1 : i32, i32, i32
  }
  func.func @transform_9(%arg0: i32) -> (i32, i32) {
    %c0_i32 = arith.constant 0 : i32
    %c0_i32_0 = arith.constant 0 : i32
    %c0_i32_1 = arith.constant 0 : i32
    return %c0_i32, %c0_i32_0 : i32, i32
  }
  func.func @transform_10(%arg0: i32) -> (i32, i32) {
    %c0_i32 = arith.constant 0 : i32
    %c0_i32_0 = arith.constant 0 : i32
    %c0_i32_1 = arith.constant 0 : i32
    return %c0_i32, %c0_i32_0 : i32, i32
  }
  func.func @transform_11(%arg0: i32) -> (i32, i32) {
    %c0_i32 = arith.constant 0 : i32
    %c0_i32_0 = arith.constant 0 : i32
    %c0_i32_1 = arith.constant 0 : i32
    return %c0_i32, %c0_i32_0 : i32, i32
  }
  func.func @transform_12(%arg0: i32) -> (i32, i32) {
    %c0_i32 = arith.constant 0 : i32
    %c0_i32_0 = arith.constant 0 : i32
    %c0_i32_1 = arith.constant 0 : i32
    return %c0_i32, %c0_i32_0 : i32, i32
  }
  func.func @transform_13(%arg0: i32) -> (i32, i32) {
    %c0_i32 = arith.constant 0 : i32
    %c0_i32_0 = arith.constant 0 : i32
    %c0_i32_1 = arith.constant 0 : i32
    return %c0_i32, %c0_i32_0 : i32, i32
  }
}

</mosaic_0001>

<bundles_post_ra>
// kernel: kkbox_sentiment_classifier.1
= control target key start
LH: loop header
LB: loop body
LE: loop exit
PB: predicated region body
PF: predicated region fallthrough
CT: control target
= control target key end

     0   :  { %vm85_vm0 = vcmask 261120   ;;  %s3692_s0 = inlined_call_operand.vmem [shape: f32[16,32], index: 0, kind: input, shape index: {}]   ;;  %s3693_s1 = inlined_call_operand.vmem [shape: f32[2,8], index: 1, kind: input, shape index: {}]   ;;  %s3694_s2 = inlined_call_operand.vmem [shape: f32[2,32,96], index: 2, kind: input, shape index: {}]   ;;  %s3695_s3 = inlined_call_operand.vmem [shape: f32[2,1,96], index: 3, kind: input, shape index: {}]   ;;  %s3696_s4 = inlined_call_operand.vmem [shape: f32[2,32,32], index: 4, kind: input, shape index: {}]   ;;  %s3697_s5 = inlined_call_operand.vmem [shape: f32[2,32,64], index: 5, kind: input, shape index: {}]   ;;  %s3698_s6 = inlined_call_operand.vmem [shape: f32[2,1,64], index: 6, kind: input, shape index: {}]   ;;  %s3699_s7 = inlined_call_operand.vmem [shape: f32[2,64,32], index: 7, kind: input, shape index: {}]   ;;  %s3700_s8 = inlined_call_operand.vmem [shape: f32[2,6,32], index: 8, kind: input, shape index: {}]   ;;  %s3701_s9 = inlined_call_operand.vmem [shape: f32[32,32], index: 9, kind: input, shape index: {}]   ;;  %s3702_s10 = inlined_call_operand.vmem [shape: f32[1,32], index: 10, kind: input, shape index: {}]   ;;  %s3703_s11 = inlined_call_operand.vmem [shape: f32[32,2], index: 11, kind: input, shape index: {}]   ;;  %s3704_s12 = inlined_call_operand.vmem [shape: f32[1,2], index: 12, kind: input, shape index: {}]   ;;  %s3705_s13 = inlined_call_operand.hbm [shape: f32[2,2], index: 13, kind: output, shape index: {}]  }
   0x1   :  { %v74_v0 = vld [vmem:[%s3694_s2] sm:$0xff]  ;;  %v75_v1 = vld [vmem:[%s3694_s2 + $0x8] sm:$0xff]  ;;  %v76_v2 = vld [vmem:[%s3694_s2 + $0x10] sm:$0xff] }
   0x2   :  { %v2953_v3 = vpack.c.bf16 %v75_v1, %v74_v0  ;;  %v77_v4 = vld [vmem:[%s3694_s2 + $0x18] sm:$0xff]  ;;  %v3238_v5 = vld [vmem:[%s3692_s0] sm:$0xff] }
   0x3   :  { %v2957_v6 = vpack.c.bf16 %v77_v4, %v76_v2  ;;  %2755 = vmatprep.mubr.msk.f32.mxu0 %vm85_vm0, %v3238_v5 }
   0x4   :  { %18 = vsyncpa [#allocation3], 0  ;;  %2954 = vmatprep.subr.bf16.mxu0 %v2953_v3  ;;  %v3245_v7 = vld [vmem:[%s3692_s0 + $0x8] sm:$0xff]  ;;  %v3142_v8 = vmov 0.0   ;;  %vm3143_vm1 = vmmov 0   ;;  %s3144_s0 = smov 96   ;;  %v54_v18 = vlaneseq }
   0x5   :  { %2956 = vmatpush3.bf16.msra.mxu0 %v2953_v3  ;;  %2758 = vmatprep.subr.mxu1 %v3142_v8  ;;  %v2578_v9 = vld [vmem:[%s3695_s3] ss:$0 sm:$0xff]  ;;  %vm170_vm2 = vcmask 130048   ;;  %v3145_v16 = vmov 1966171168   ;;  %vm336_vm3 = vcmask 64512  }
   0x6   :  { %2958 = vmatprep.subr.bf16.mxu0 %v2957_v6  ;;  %2760 = vmatprep.mubr.msk.f32.mxu1 %vm3143_vm1, %v3142_v8  ;;  %v52_v17 = vunpack.c.l.s4 %v3145_v16  ;;  %v47_v19 = vld [vmem:[%s3693_s1] sm:$0x3]  ;;  %v3281_v22 = vshrl.u32 %v54_v18, 7  ;;  %s3146_s1 = smov 64   ;;  %s3147_s24 = smov 80   ;;  %vm1107_vm4 = vcmask 523264  }
   0x7   :  { %v48_v20 = vsub.f32 1.0, %v47_v19  ;;  %s3148_s25 = smov 112   ;;  %s3149_s26 = smov 48   ;;  %vm2380_vm5 = vcmask 1040384   ;;  %vm2551_vm6 = vcmask 9216  }
   0x8   :  { %v53_v21 = vunpack.c.0.s8 %v52_v17  ;;  %v3285_v27 = vsub.s32 0, %v3281_v22  ;;  %s3150_s18 = smov 16  }
   0x9   :  { %2960 = vmatpush3.bf16.msra.mxu0 %v2957_v6  ;;  %v49_v23 = vmul.f32 -1e+09, %v48_v20 }
   0xa   :  { %2768 = vmatprep.subr.mxu0 %v3142_v8  ;;  %v56_v24 = vsub.s32 %v53_v21, %v3281_v22 }
   0xc   :  { %2756 = vmatmul.mubr.msk.f32.vlgmr.msra.gmra.mrb[0].mxu0 %vm85_vm0, %v3245_v7  ;;  %v57_v25 = vrot.slane %v49_v23, %v56_v24 }
   0xd   :  { %2770 = vmatprep.mubr.msk.f32.mxu0 %vm3143_vm1, %v3142_v8 }
   0xe   :  { %v65_v26 = vrot.slane %v57_v25, %v56_v24  ;;  %v58_v28 = vcombine.high %v57_v25, %v57_v25 }
  0x10   :  { %v3288_v29 = vrot.slane %v65_v26, %v3285_v27  ;;  %v72_v30 = vrot.slane %v58_v28, %v56_v24 }
  0x12   :  { %v3292_v35 = vrot.slane %v72_v30, %v3285_v27 }
  0xdf   :  { %v2757_v10 = vpop.f32.mrb[0].mxu0 }
  0xe0   :  { %v158_v11 = vpop.f32.mrb[1].mxu0  ;;  %v3262_v13 = vadd.f32 %v2757_v10, %v2578_v9 }
  0xe1   :  { %v3258_v12 = vadd.f32 %v2578_v9, %v158_v11 }
  0xe3   :  { %168 = vrot.lane.b32.xlu0 %v3258_v12, %s3144_s0 }
  0xe7   :  { %246 = vrot.lane.b32.xlu0 %v3262_v13, %s3144_s0 }
 0x155   :  { %v169_v14 = vpop.permute.xlu0 %168 }
 0x156   :  { %2759 = vmatpush3.xpose.msk.msra.mxu1 %vm170_vm2, %v169_v14 }
 0x157   :  { %2763 = vmatprep.subr.mxu1 %v3142_v8 }
 0x159   :  { %2761 = vmatmul.mubr.msk.f32.vlgmr.msra.gmra.mrb[0].mxu1 %vm170_vm2, %v3258_v12  ;;  %v247_v15 = vpop.permute.xlu0 %246 }
 0x15a   :  { %2764 = vmatpush3.xpose.msk.msra.mxu1 %vm170_vm2, %v247_v15  ;;  %2765 = vmatprep.mubr.msk.f32.mxu1 %vm3143_vm1, %v3142_v8 }
 0x15b   :  { %2773 = vmatprep.subr.mxu1 %v3142_v8 }
 0x15d   :  { %2766 = vmatmul.mubr.msk.f32.vlgmr.msra.gmra.mrb[2].mxu1 %vm170_vm2, %v3262_v13 }
 0x15e   :  { %2775 = vmatprep.mubr.msk.f32.mxu1 %vm3143_vm1, %v3142_v8 }
 0x22c   :  { %v241_v31 = vpop.f32.mrb[0].mxu1 }
 0x22d   :  { %v322_v32 = vmul.f32 0.25, %v241_v31  ;;  %v2762_v33 = vpop.f32.mrb[1].mxu1 }
 0x22f   :  { %v334_v34 = vadd.f32 %v3288_v29, %v322_v32 }
 0x230   :  { %v318_v36 = vpop.f32.mrb[2].mxu1 }
 0x231   :  { %v323_v37 = vmul.f32 0.25, %v318_v36  ;;  %v2767_v38 = vpop.f32.mrb[3].mxu1  ;;  %v337_v39 = vsel %vm336_vm3, %v334_v34, -inf }
 0x232   :  { %338 = vmax.xlane.f32.xlu1 %v337_v39 }
 0x233   :  { %v335_v40 = vadd.f32 %v3292_v35, %v323_v37 }
 0x235   :  { %v340_v41 = vsel %vm336_vm3, %v335_v40, -inf }
 0x236   :  { %341 = vmax.xlane.f32.xlu1 %v340_v41 }
 0x247   :  { %359 = vrot.lane.b32.xlu1 %v3258_v12, %s3146_s1 }
 0x24b   :  { %435 = vrot.lane.b32.xlu1 %v3262_v13, %s3146_s1 }
 0x24f   :  { %513 = vrot.lane.b32.xlu1 %v3258_v12, %s3147_s24 }
 0x253   :  { %591 = vrot.lane.b32.xlu1 %v3262_v13, %s3147_s24 }
 0x2bf   :  { %v339_v42 = vpop.xlane.xlu1 %338 }
 0x2c0   :  { %v343_v43 = vsub.f32 %v334_v34, %v339_v42  ;;  %v857_v42 = vld [vmem:[%s3696_s4 + $0x10] sm:$0xff] }
 0x2c2   :  { %v345_v44 = vmul.f32 1.442695, %v343_v43  ;;  %v858_v43 = vld [vmem:[%s3696_s4 + $0x18] sm:$0xff] }
 0x2c3   :  { %v342_v45 = vpop.xlane.xlu1 %341 }
 0x2c4   :  { %3056 = vpow2.f32 %v345_v44  ;;  %v344_v46 = vsub.f32 %v335_v40, %v342_v45  ;;  %v855_v40 = vld [vmem:[%s3696_s4] sm:$0xff]  ;;  %v2965_v44 = vpack.c.bf16 %v858_v43, %v857_v42  ;;  %v1098_v42 = vld [vmem:[%s3699_s7 + $0x18] sm:$0xff] }
 0x2c6   :  { %v347_v47 = vmul.f32 1.442695, %v344_v46 }
 0x2c7   :  { %v360_v48 = vpop.permute.xlu1 %359 }
 0x2c8   :  { %3058 = vpow2.f32 %v347_v47  ;;  %2769 = vmatpush3.msra.mxu0 %v360_v48 }
 0x2c9   :  { %2778 = vmatprep.subr.mxu0 %v3142_v8 }
 0x2cb   :  { %v436_v49 = vpop.permute.xlu1 %435 }
 0x2cc   :  { %2774 = vmatpush3.msra.mxu1 %v436_v49 }
 0x2cd   :  { %2783 = vmatprep.subr.mxu1 %v3142_v8 }
 0x2ce   :  { %v3057_v50 = vpop.eup %3056 }
 0x2cf   :  { %v349_v51 = vsel %vm336_vm3, %v3057_v50, 0.0  ;;  %v514_v54 = vpop.permute.xlu1 %513 }
 0x2d0   :  { %350 = vadd.xlane.f32.xlu0 %v349_v51 }
 0x2d2   :  { %v3059_v52 = vpop.eup %3058 }
 0x2d3   :  { %v352_v53 = vsel %vm336_vm3, %v3059_v52, 0.0  ;;  %v592_v55 = vpop.permute.xlu1 %591 }
 0x2d4   :  { %353 = vadd.xlane.f32.xlu1 %v352_v53  ;;  %v3368_v53 = vld [vmem:[%s3700_s8] sm:$0x3f] }
 0x2e5   :  { %589 = vrot.lane.b32.xlu1 %v3262_v13, %s3148_s25 }
 0x2e6   :  { %511 = vrot.lane.b32.xlu0 %v3258_v12, %s3148_s25 }
 0x35d   :  { %v351_v56 = vpop.xlane.xlu0 %350 }
 0x35e   :  { %3060 = vrcp.f32 %v351_v56 }
 0x361   :  { %v354_v57 = vpop.xlane.xlu1 %353  ;;  %v512_v62 = vpop.permute.xlu0 %511 }
 0x362   :  { %3062 = vrcp.f32 %v354_v57 }
 0x365   :  { %v590_v63 = vpop.permute.xlu1 %589 }
 0x368   :  { %v3061_v58 = vpop.eup %3060 }
 0x369   :  { %v357_v59 = vmul.f32 %v3061_v58, %v3057_v50 }
 0x36b   :  { %2771 = vmatmul.mubr.msk.f32.vlgmr.msra.gmra.mrb[2].mxu0 %vm336_vm3, %v357_v59 }
 0x36c   :  { %v3063_v60 = vpop.eup %3062  ;;  %2779 = vmatpush3.xpose.msk.msra.mxu0 %vm170_vm2, %v514_v54  ;;  %2780 = vmatprep.mubr.msk.f32.mxu0 %vm3143_vm1, %v3142_v8  ;;  %v862_v54 = vrot.slane %v3368_v53, %v3285_v27 }
 0x36d   :  { %v358_v61 = vmul.f32 %v3063_v60, %v3059_v52  ;;  %2788 = vmatprep.subr.mxu0 %v3142_v8 }
 0x36f   :  { %2776 = vmatmul.mubr.msk.f32.vlgmr.msra.gmra.mrb[4].mxu1 %vm336_vm3, %v358_v61  ;;  %2781 = vmatmul.mubr.msk.f32.vlgmr.msra.gmra.mrb[4].mxu0 %vm170_vm2, %v512_v62 }
 0x370   :  { %2784 = vmatpush3.xpose.msk.msra.mxu1 %vm170_vm2, %v592_v55  ;;  %2785 = vmatprep.mubr.msk.f32.mxu1 %vm3143_vm1, %v3142_v8 }
 0x371   :  { %2793 = vmatprep.subr.mxu1 %v3142_v8  ;;  %2790 = vmatprep.mubr.msk.f32.mxu0 %vm3143_vm1, %v3142_v8 }
 0x373   :  { %2786 = vmatmul.mubr.msk.f32.vlgmr.msra.gmra.mrb[6].mxu1 %vm170_vm2, %v590_v63 }
 0x374   :  { %2795 = vmatprep.mubr.msk.f32.mxu1 %vm3143_vm1, %v3142_v8 }
 0x43e   :  { %v3329_v0 = vpop.f32.mrb[2].mxu0 }
 0x43f   :  { %v2772_v1 = vpop.f32.mrb[3].mxu0 }
 0x442   :  { %v3331_v2 = vpop.f32.mrb[4].mxu1  ;;  %v585_v3 = vpop.f32.mrb[4].mxu0 }
 0x443   :  { %v667_v4 = vmul.f32 0.25, %v585_v3  ;;  %v2777_v6 = vpop.f32.mrb[5].mxu1  ;;  %v2782_v9 = vpop.f32.mrb[5].mxu0 }
 0x445   :  { %v669_v10 = vadd.f32 %v667_v4, %v3288_v29 }
 0x446   :  { %v663_v11 = vpop.f32.mrb[6].mxu1 }
 0x447   :  { %v668_v14 = vmul.f32 0.25, %v663_v11  ;;  %v2787_v15 = vpop.f32.mrb[7].mxu1  ;;  %v671_v16 = vsel %vm336_vm3, %v669_v10, -inf  ;;  %v986_v11 = vld [vmem:[%s3697_s5 + $0x8] sm:$0xff] }
 0x448   :  { %672 = vmax.xlane.f32.xlu1 %v671_v16  ;;  %v987_v15 = vld [vmem:[%s3697_s5 + $0x10] sm:$0xff]  ;;  %v988_v16 = vld [vmem:[%s3697_s5 + $0x18] sm:$0xff] }
 0x449   :  { %v670_v17 = vadd.f32 %v668_v14, %v3292_v35 }
 0x44b   :  { %v674_v18 = vsel %vm336_vm3, %v670_v17, -inf }
 0x44c   :  { %675 = vmax.xlane.f32.xlu0 %v674_v18 }
 0x462   :  { %769 = vrot.lane.b32.xlu0 %v3262_v13, %s3149_s26 }
 0x4d5   :  { %v673_v19 = vpop.xlane.xlu1 %672 }
 0x4d6   :  { %v677_v20 = vsub.f32 %v669_v10, %v673_v19 }
 0x4d8   :  { %v679_v21 = vmul.f32 1.442695, %v677_v20 }
 0x4d9   :  { %v676_v23 = vpop.xlane.xlu0 %675 }
 0x4da   :  { %3064 = vpow2.f32 %v679_v21  ;;  %v678_v24 = vsub.f32 %v670_v17, %v676_v23  ;;  %v2973_v17 = vpack.c.bf16 %v988_v16, %v987_v15 }
 0x4dc   :  { %v681_v25 = vmul.f32 1.442695, %v678_v24 }
 0x4dd   :  { %v770_v26 = vpop.permute.xlu0 %769 }
 0x4de   :  { %3066 = vpow2.f32 %v681_v25  ;;  %2794 = vmatpush3.msra.mxu1 %v770_v26  ;;  %v975_v25 = vsub.s32 1, %v3281_v22  ;;  %v981_v26 = vsub.s32 2, %v3281_v22 }
 0x4e4   :  { %v3065_v28 = vpop.eup %3064 }
 0x4e5   :  { %v683_v30 = vsel %vm336_vm3, %v3065_v28, 0.0 }
 0x4e6   :  { %684 = vadd.xlane.f32.xlu1 %v683_v30 }
 0x4e8   :  { %v3067_v31 = vpop.eup %3066 }
 0x4e9   :  { %v686_v32 = vsel %vm336_vm3, %v3067_v31, 0.0 }
 0x4ea   :  { %687 = vadd.xlane.f32.xlu1 %v686_v32  ;;  %v982_v32 = vrot.slane %v3368_v53, %v981_v26 }
 0x4fb   :  { %693 = vrot.lane.b32.xlu1 %v3258_v12, %s3149_s26  ;;  %v856_v12 = vld [vmem:[%s3696_s4 + $0x8] sm:$0xff] }
 0x4fc   :  { %v2961_v41 = vpack.c.bf16 %v856_v12, %v855_v40  ;;  %v1096_v40 = vld [vmem:[%s3699_s7 + $0x8] sm:$0xff] }
 0x573   :  { %v685_v13 = vpop.xlane.xlu1 %684 }
 0x574   :  { %3068 = vrcp.f32 %v685_v13 }
 0x577   :  { %v688_v33 = vpop.xlane.xlu1 %687 }
 0x578   :  { %3070 = vrcp.f32 %v688_v33 }
 0x57b   :  { %v694_v34 = vpop.permute.xlu1 %693 }
 0x57c   :  { %2789 = vmatpush3.msra.mxu0 %v694_v34 }
 0x57d   :  { %2962 = vmatprep.subr.bf16.mxu0 %v2961_v41 }
 0x57e   :  { %v3069_v36 = vpop.eup %3068 }
 0x57f   :  { %v691_v37 = vmul.f32 %v3069_v36, %v3065_v28  ;;  %v976_v28 = vrot.slane %v3368_v53, %v975_v25 }
 0x581   :  { %2791 = vmatmul.mubr.msk.f32.vlgmr.msra.gmra.mrb[6].mxu0 %vm336_vm3, %v691_v37 }
 0x582   :  { %v3071_v38 = vpop.eup %3070  ;;  %2964 = vmatpush3.bf16.msra.mxu0 %v2961_v41  ;;  %v1097_v41 = vld [vmem:[%s3699_s7 + $0x10] sm:$0xff] }
 0x583   :  { %v692_v39 = vmul.f32 %v3071_v38, %v3067_v31  ;;  %2966 = vmatprep.subr.bf16.mxu0 %v2965_v44  ;;  %v2981_v43 = vpack.c.bf16 %v1098_v42, %v1097_v41  ;;  %v2604_v41 = vld [vmem:[%s3694_s2 + $0x38] sm:$0xff] }
 0x585   :  { %2796 = vmatmul.mubr.msk.f32.vlgmr.msra.gmra.mrb[8].mxu1 %vm336_vm3, %v692_v39  ;;  %v1095_v39 = vld [vmem:[%s3699_s7] sm:$0xff] }
 0x586   :  { %2968 = vmatpush3.bf16.msra.mxu0 %v2965_v44  ;;  %v2977_v12 = vpack.c.bf16 %v1096_v40, %v1095_v39  ;;  %v1099_v44 = vld [vmem:[%s3699_s7 + $0x20] sm:$0xff]  ;;  %v2602_v39 = vld [vmem:[%s3694_s2 + $0x28] sm:$0xff] }
 0x588   :  { %2978 = vmatprep.subr.bf16.mxu0 %v2977_v12 }
 0x654   :  { %v765_v45 = vpop.f32.mrb[6].mxu0 }
 0x655   :  { %847 = vrot.lane.b32.xlu1 %v765_v45, %s3150_s18  ;;  %v2792_v46 = vpop.f32.mrb[7].mxu0  ;;  %v1100_v45 = vld [vmem:[%s3699_s7 + $0x28] sm:$0xff] }
 0x656   :  { %v2985_v46 = vpack.c.bf16 %v1100_v45, %v1099_v44 }
 0x658   :  { %v841_v47 = vpop.f32.mrb[8].mxu1 }
 0x659   :  { %849 = vrot.lane.b32.xlu1 %v841_v47, %s3150_s18  ;;  %v2797_v48 = vpop.f32.mrb[9].mxu1  ;;  %v1101_v47 = vld [vmem:[%s3699_s7 + $0x30] sm:$0xff] }
 0x65a   :  { %v1102_v48 = vld [vmem:[%s3699_s7 + $0x38] sm:$0xff] }
 0x6c7   :  { %v848_v49 = vpop.permute.xlu1 %847 }
 0x6c8   :  { %v853_v50 = vsel %vm170_vm2, %v3329_v0, %v848_v49  ;;  %v2989_v49 = vpack.c.bf16 %v1102_v48, %v1101_v47 }
 0x6c9   :  { %2806 = vmatprep.mubr.msk.f32.mxu0 %vm85_vm0, %v853_v50  ;;  %v2595_v50 = vld [vmem:[%s3698_s6] ss:$0 sm:$0xff] }
 0x6cb   :  { %v850_v51 = vpop.permute.xlu1 %849 }
 0x6cc   :  { %v854_v52 = vsel %vm170_vm2, %v3331_v2, %v850_v51 }
 0x6cd   :  { %2807 = vmatmul.mubr.msk.f32.vlgmr.msra.gmra.mrb[8].mxu0 %vm85_vm0, %v854_v52 }
 0x6ce   :  { %2980 = vmatpush3.bf16.msra.mxu0 %v2977_v12  ;;  %v2603_v12 = vld [vmem:[%s3694_s2 + $0x30] sm:$0xff] }
 0x6cf   :  { %2982 = vmatprep.subr.bf16.mxu0 %v2981_v43  ;;  %v2997_v42 = vpack.c.bf16 %v2604_v41, %v2603_v12 }
 0x6d2   :  { %2984 = vmatpush3.bf16.msra.mxu0 %v2981_v43 }
 0x6d3   :  { %2986 = vmatprep.subr.bf16.mxu0 %v2985_v46 }
 0x6d6   :  { %2988 = vmatpush3.bf16.msra.mxu0 %v2985_v46 }
 0x6d7   :  { %2990 = vmatprep.subr.bf16.mxu0 %v2989_v49 }
 0x6da   :  { %2992 = vmatpush3.bf16.msra.mxu0 %v2989_v49  ;;  %v1219_v49 = vsub.s32 4, %v3281_v22 }
 0x6db   :  { %2860 = vmatprep.subr.mxu0 %v3142_v8 }
 0x7a0   :  { %v2808_v55 = vpop.f32.mrb[8].mxu0 }
 0x7a1   :  { %v941_v56 = vadd.f32 %v2808_v55, %v862_v54  ;;  %v935_v57 = vpop.f32.mrb[9].mxu0 }
 0x7a2   :  { %v936_v58 = vadd.f32 %v935_v57, %v862_v54 }
 0x7a3   :  { %v945_v59 = vadd.f32 %v941_v56, %v3245_v7 }
 0x7a4   :  { %v944_v60 = vadd.f32 %v936_v58, %v3238_v5  ;;  %v985_v5 = vld [vmem:[%s3697_s5] sm:$0xff] }
 0x7a5   :  { %v949_v61 = vsel %vm85_vm0, %v945_v59, 0.0  ;;  %v2969_v14 = vpack.c.bf16 %v986_v11, %v985_v5  ;;  %v1105_v11 = vsub.s32 3, %v3281_v22 }
 0x7a6   :  { %950 = vadd.xlane.f32.xlu1 %v949_v61  ;;  %v946_v62 = vsel %vm85_vm0, %v944_v60, 0.0 }
 0x7a7   :  { %947 = vadd.xlane.f32.xlu0 %v946_v62  ;;  %2970 = vmatprep.subr.bf16.mxu1 %v2969_v14 }
 0x7a8   :  { %2972 = vmatpush3.bf16.msra.mxu1 %v2969_v14  ;;  %v1106_v14 = vrot.slane %v3368_v53, %v1105_v11 }
 0x7a9   :  { %2974 = vmatprep.subr.bf16.mxu1 %v2973_v17 }
 0x7ac   :  { %2976 = vmatpush3.bf16.msra.mxu1 %v2973_v17 }
 0x833   :  { %v951_v63 = vpop.xlane.xlu1 %950 }
 0x834   :  { %v954_v0 = vmul.f32 0.03125, %v951_v63  ;;  %v948_v1 = vpop.xlane.xlu0 %947 }
 0x835   :  { %v953_v2 = vmul.f32 0.03125, %v948_v1 }
 0x836   :  { %v956_v3 = vsub.f32 %v945_v59, %v954_v0 }
 0x837   :  { %v955_v4 = vsub.f32 %v944_v60, %v953_v2 }
 0x838   :  { %v958_v10 = vmul.f32 %v956_v3, %v956_v3 }
 0x839   :  { %v957_v6 = vmul.f32 %v955_v4, %v955_v4 }
 0x83a   :  { %v962_v7 = vsel %vm85_vm0, %v958_v10, 0.0 }
 0x83b   :  { %v959_v9 = vsel %vm85_vm0, %v957_v6, 0.0 }
 0x83c   :  { %960 = vadd.xlane.f32.xlu0 %v959_v9 }
 0x840   :  { %963 = vadd.xlane.f32.xlu0 %v962_v7 }
 0x8c9   :  { %v961_v18 = vpop.xlane.xlu0 %960 }
 0x8ca   :  { %v965_v19 = vmul.f32 0.03125, %v961_v18 }
 0x8cc   :  { %v967_v20 = vadd.f32 1e-12, %v965_v19 }
 0x8cd   :  { %v964_v21 = vpop.xlane.xlu0 %963 }
 0x8ce   :  { %3072 = vrsqrt.f32 %v967_v20  ;;  %v966_v23 = vmul.f32 0.03125, %v964_v21 }
 0x8d0   :  { %v968_v24 = vadd.f32 1e-12, %v966_v23 }
 0x8d2   :  { %3074 = vrsqrt.f32 %v968_v24 }
 0x8d8   :  { %v3073_v30 = vpop.eup %3072 }
 0x8d9   :  { %v971_v31 = vmul.f32 %v3073_v30, %v955_v4 }
 0x8db   :  { %v977_v13 = vmul.f32 %v976_v28, %v971_v31 }
 0x8dc   :  { %v3075_v33 = vpop.eup %3074 }
 0x8dd   :  { %v972_v34 = vmul.f32 %v3075_v33, %v956_v3  ;;  %v983_v36 = vadd.f32 %v982_v32, %v977_v13 }
 0x8df   :  { %v978_v37 = vmul.f32 %v976_v28, %v972_v34  ;;  %2817 = vmatprep.mubr.msk.f32.mxu1 %vm85_vm0, %v983_v36 }
 0x8e1   :  { %v984_v38 = vadd.f32 %v982_v32, %v978_v37 }
 0x8e3   :  { %2818 = vmatmul.mubr.msk.f32.vlgmr.msra.gmra.mrb[10].mxu1 %vm85_vm0, %v984_v38 }
 0x9b6   :  { %v2819_v51 = vpop.f32.mrb[10].mxu1 }
 0x9b7   :  { %v1074_v52 = vadd.f32 %v2819_v51, %v2595_v50  ;;  %v1068_v54 = vpop.f32.mrb[11].mxu1  ;;  %v1220_v51 = vrot.slane %v3368_v53, %v1219_v49 }
 0x9b8   :  { %v1069_v55 = vadd.f32 %v2595_v50, %v1068_v54  ;;  %v1225_v50 = vsub.s32 5, %v3281_v22  ;;  %v2468_v22 = vld [vmem:[%s3703_s11 + $0x8] sm:$0xff] }
 0x9b9   :  { %v1078_v56 = vmul.f32 %v1074_v52, %v1074_v52 }
 0x9ba   :  { %v1077_v57 = vmul.f32 %v1069_v55, %v1069_v55 }
 0x9bb   :  { %v1080_v58 = vmul.f32 %v1078_v56, %v1074_v52 }
 0x9bc   :  { %v1079_v59 = vmul.f32 %v1077_v57, %v1069_v55  ;;  %v1226_v57 = vrot.slane %v3368_v53, %v1225_v50 }
 0x9bd   :  { %v1082_v60 = vmul.f32 0.044715, %v1080_v58 }
 0x9be   :  { %v1081_v61 = vmul.f32 0.044715, %v1079_v59 }
 0x9bf   :  { %v1084_v62 = vadd.f32 %v1082_v60, %v1074_v52 }
 0x9c0   :  { %v1083_v63 = vadd.f32 %v1081_v61, %v1069_v55 }
 0x9c1   :  { %v1086_v0 = vmul.f32 0.7978846, %v1084_v62  ;;  %v2606_v62 = vld [vmem:[%s3695_s3 + $0x1] ss:$0 sm:$0xff] }
 0x9c2   :  { %v1085_v1 = vmul.f32 0.7978846, %v1083_v63 }
 0x9c3   :  { %3076 = vtanh.f32 %v1086_v0 }
 0x9c4   :  { %3078 = vtanh.f32 %v1085_v1 }
 0x9cd   :  { %v3077_v2 = vpop.eup %3076 }
 0x9ce   :  { %v3079_v3 = vpop.eup %3078  ;;  %v1090_v4 = vadd.f32 1.0, %v3077_v2 }
 0x9cf   :  { %v1089_v6 = vadd.f32 1.0, %v3079_v3 }
 0x9d0   :  { %v1092_v9 = vmul.f32 0.5, %v1090_v4 }
 0x9d1   :  { %v1091_v10 = vmul.f32 0.5, %v1089_v6 }
 0x9d2   :  { %v1094_v5 = vmul.f32 %v1092_v9, %v1074_v52 }
 0x9d3   :  { %v1093_v7 = vmul.f32 %v1091_v10, %v1069_v55 }
 0x9d5   :  { %2836 = vmatprep.mubr.msk.f32.mxu0 %vm1107_vm4, %v1093_v7 }
 0x9d6   :  { %2837 = vmatmul.mubr.msk.f32.vlgmr.msra.gmra.mrb[10].mxu0 %vm1107_vm4, %v1094_v5 }
 0x9d7   :  { %2862 = vmatprep.mubr.msk.f32.mxu0 %vm3143_vm1, %v3142_v8 }
 0xaa9   :  { %v2838_v15 = vpop.f32.mrb[10].mxu0 }
 0xaaa   :  { %v1186_v16 = vadd.f32 %v2838_v15, %v1106_v14  ;;  %v1180_v17 = vpop.f32.mrb[11].mxu0 }
 0xaab   :  { %v1181_v18 = vadd.f32 %v1180_v17, %v1106_v14 }
 0xaac   :  { %v1190_v19 = vadd.f32 %v1186_v16, %v984_v38 }
 0xaad   :  { %v1189_v20 = vadd.f32 %v1181_v18, %v983_v36  ;;  %v2601_v36 = vld [vmem:[%s3694_s2 + $0x20] sm:$0xff] }
 0xaae   :  { %v1194_v21 = vsel %vm85_vm0, %v1190_v19, 0.0  ;;  %v2993_v40 = vpack.c.bf16 %v2602_v39, %v2601_v36 }
 0xaaf   :  { %1195 = vadd.xlane.f32.xlu0 %v1194_v21  ;;  %v1191_v23 = vsel %vm85_vm0, %v1189_v20, 0.0 }
 0xab0   :  { %1192 = vadd.xlane.f32.xlu1 %v1191_v23  ;;  %2994 = vmatprep.subr.bf16.mxu1 %v2993_v40 }
 0xab1   :  { %2996 = vmatpush3.bf16.msra.mxu1 %v2993_v40 }
 0xab2   :  { %2998 = vmatprep.subr.bf16.mxu1 %v2997_v42 }
 0xab5   :  { %3000 = vmatpush3.bf16.msra.mxu1 %v2997_v42 }
 0xab6   :  { %2850 = vmatprep.subr.mxu1 %v3142_v8 }
 0xb3c   :  { %v1196_v24 = vpop.xlane.xlu0 %1195 }
 0xb3d   :  { %v1198_v28 = vmul.f32 0.03125, %v1196_v24  ;;  %v1193_v30 = vpop.xlane.xlu1 %1192 }
 0xb3e   :  { %v1197_v31 = vmul.f32 0.03125, %v1193_v30 }
 0xb3f   :  { %v1200_v32 = vsub.f32 %v1190_v19, %v1198_v28 }
 0xb40   :  { %v1199_v13 = vsub.f32 %v1189_v20, %v1197_v31 }
 0xb41   :  { %v1202_v33 = vmul.f32 %v1200_v32, %v1200_v32 }
 0xb42   :  { %v1201_v34 = vmul.f32 %v1199_v13, %v1199_v13 }
 0xb43   :  { %v1206_v37 = vsel %vm85_vm0, %v1202_v33, 0.0 }
 0xb44   :  { %1207 = vadd.xlane.f32.xlu0 %v1206_v37  ;;  %v1203_v38 = vsel %vm85_vm0, %v1201_v34, 0.0 }
 0xb45   :  { %1204 = vadd.xlane.f32.xlu1 %v1203_v38 }
 0xbd1   :  { %v1208_v43 = vpop.xlane.xlu0 %1207 }
 0xbd2   :  { %v1210_v44 = vmul.f32 0.03125, %v1208_v43  ;;  %v1205_v45 = vpop.xlane.xlu1 %1204 }
 0xbd3   :  { %v1209_v46 = vmul.f32 0.03125, %v1205_v45 }
 0xbd4   :  { %v1212_v47 = vadd.f32 1e-12, %v1210_v44 }
 0xbd5   :  { %v1211_v48 = vadd.f32 1e-12, %v1209_v46 }
 0xbd6   :  { %3080 = vrsqrt.f32 %v1212_v47 }
 0xbd7   :  { %3082 = vrsqrt.f32 %v1211_v48 }
 0xbe0   :  { %v3081_v52 = vpop.eup %3080 }
 0xbe1   :  { %v3083_v54 = vpop.eup %3082  ;;  %v1216_v55 = vmul.f32 %v3081_v52, %v1200_v32 }
 0xbe2   :  { %v1215_v56 = vmul.f32 %v3083_v54, %v1199_v13 }
 0xbe3   :  { %v1222_v58 = vmul.f32 %v1220_v51, %v1216_v55 }
 0xbe4   :  { %v1221_v59 = vmul.f32 %v1220_v51, %v1215_v56 }
 0xbe5   :  { %v3463_v61 = vadd.f32 %v1226_v57, %v1222_v58 }
 0xbe6   :  { %v3461_v60 = vadd.f32 %v1226_v57, %v1221_v59 }
 0xbe8   :  { %2847 = vmatprep.mubr.msk.f32.mxu1 %vm85_vm0, %v3461_v60 }
 0xbe9   :  { %2848 = vmatmul.mubr.msk.f32.vlgmr.msra.gmra.mrb[12].mxu1 %vm85_vm0, %v3463_v61 }
 0xbea   :  { %2852 = vmatprep.mubr.msk.f32.mxu1 %vm3143_vm1, %v3142_v8 }
 0xcbc   :  { %v2849_v53 = vpop.f32.mrb[12].mxu1 }
 0xcbd   :  { %v3474_v63 = vadd.f32 %v2849_v53, %v2606_v62  ;;  %v1316_v0 = vpop.f32.mrb[13].mxu1 }
 0xcbe   :  { %v3476_v1 = vadd.f32 %v2606_v62, %v1316_v0 }
 0xcbf   :  { %1403 = vrot.lane.b32.xlu0 %v3474_v63, %s3144_s0 }
 0xcc0   :  { %1326 = vrot.lane.b32.xlu1 %v3476_v1, %s3144_s0 }
 0xd31   :  { %v1404_v3 = vpop.permute.xlu0 %1403 }
 0xd32   :  { %v1327_v2 = vpop.permute.xlu1 %1326 }
 0xd33   :  { %2851 = vmatpush3.xpose.msk.msra.mxu1 %vm170_vm2, %v1327_v2 }
 0xd34   :  { %2855 = vmatprep.subr.mxu1 %v3142_v8 }
 0xd36   :  { %2853 = vmatmul.mubr.msk.f32.vlgmr.msra.gmra.mrb[14].mxu1 %vm170_vm2, %v3476_v1 }
 0xd37   :  { %2856 = vmatpush3.xpose.msk.msra.mxu1 %vm170_vm2, %v1404_v3  ;;  %2857 = vmatprep.mubr.msk.f32.mxu1 %vm3143_vm1, %v3142_v8 }
 0xd38   :  { %2865 = vmatprep.subr.mxu1 %v3142_v8 }
 0xd3a   :  { %2858 = vmatmul.mubr.msk.f32.vlgmr.msra.gmra.mrb[16].mxu1 %vm170_vm2, %v3474_v63 }
 0xd3b   :  { %2867 = vmatprep.mubr.msk.f32.mxu1 %vm3143_vm1, %v3142_v8 }
 0xe09   :  { %v1398_v4 = vpop.f32.mrb[14].mxu1 }
 0xe0a   :  { %v1479_v6 = vmul.f32 0.25, %v1398_v4  ;;  %v2854_v9 = vpop.f32.mrb[15].mxu1 }
 0xe0c   :  { %v1481_v10 = vadd.f32 %v1479_v6, %v3288_v29 }
 0xe0d   :  { %v1475_v7 = vpop.f32.mrb[16].mxu1 }
 0xe0e   :  { %v1480_v5 = vmul.f32 0.25, %v1475_v7  ;;  %v2859_v14 = vpop.f32.mrb[17].mxu1  ;;  %v1483_v15 = vsel %vm336_vm3, %v1481_v10, -inf }
 0xe0f   :  { %1484 = vmax.xlane.f32.xlu1 %v1483_v15 }
 0xe10   :  { %v1482_v16 = vadd.f32 %v1480_v5, %v3292_v35 }
 0xe12   :  { %v1486_v17 = vsel %vm336_vm3, %v1482_v16, -inf }
 0xe13   :  { %1487 = vmax.xlane.f32.xlu0 %v1486_v17 }
 0xe20   :  { %1505 = vrot.lane.b32.xlu1 %v3476_v1, %s3146_s1 }
 0xe24   :  { %1659 = vrot.lane.b32.xlu1 %v3476_v1, %s3147_s24 }
 0xe28   :  { %1737 = vrot.lane.b32.xlu1 %v3474_v63, %s3147_s24 }
 0xe29   :  { %1581 = vrot.lane.b32.xlu0 %v3474_v63, %s3146_s1 }
 0xe9c   :  { %v1485_v18 = vpop.xlane.xlu1 %1484 }
 0xe9d   :  { %v1489_v19 = vsub.f32 %v1481_v10, %v1485_v18 }
 0xe9f   :  { %v1491_v20 = vmul.f32 1.442695, %v1489_v19  ;;  %v2621_v19 = vld [vmem:[%s3696_s4 + $0x20] sm:$0xff] }
 0xea0   :  { %v1506_v21 = vpop.permute.xlu1 %1505  ;;  %v1488_v23 = vpop.xlane.xlu0 %1487 }
 0xea1   :  { %3084 = vpow2.f32 %v1491_v20  ;;  %v1490_v24 = vsub.f32 %v1482_v16, %v1488_v23  ;;  %2861 = vmatpush3.msra.mxu0 %v1506_v21  ;;  %v2623_v21 = vld [vmem:[%s3696_s4 + $0x30] sm:$0xff]  ;;  %v2624_v23 = vld [vmem:[%s3696_s4 + $0x38] sm:$0xff] }
 0xea2   :  { %2870 = vmatprep.subr.mxu0 %v3142_v8 }
 0xea3   :  { %v1493_v28 = vmul.f32 1.442695, %v1490_v24  ;;  %v3005_v24 = vpack.c.bf16 %v2624_v23, %v2623_v21  ;;  %v2639_v21 = vld [vmem:[%s3699_s7 + $0x60] sm:$0xff]  ;;  %v2640_v23 = vld [vmem:[%s3699_s7 + $0x68] sm:$0xff] }
 0xea4   :  { %v1582_v30 = vpop.permute.xlu0 %1581  ;;  %v1660_v34 = vpop.permute.xlu1 %1659 }
 0xea5   :  { %3086 = vpow2.f32 %v1493_v28  ;;  %2866 = vmatpush3.msra.mxu1 %v1582_v30 }
 0xea6   :  { %2875 = vmatprep.subr.mxu1 %v3142_v8 }
 0xea8   :  { %v1738_v37 = vpop.permute.xlu1 %1737 }
 0xeab   :  { %v3085_v31 = vpop.eup %3084 }
 0xeac   :  { %v1495_v32 = vsel %vm336_vm3, %v3085_v31, 0.0 }
 0xead   :  { %1496 = vadd.xlane.f32.xlu1 %v1495_v32 }
 0xeaf   :  { %v3087_v13 = vpop.eup %3086 }
 0xeb0   :  { %v1498_v33 = vsel %vm336_vm3, %v3087_v13, 0.0 }
 0xeb1   :  { %1499 = vadd.xlane.f32.xlu0 %v1498_v33 }
 0xebe   :  { %1735 = vrot.lane.b32.xlu1 %v3474_v63, %s3148_s25 }
 0xec7   :  { %1657 = vrot.lane.b32.xlu0 %v3476_v1, %s3148_s25 }
 0xf3a   :  { %v1497_v38 = vpop.xlane.xlu1 %1496 }
 0xf3b   :  { %3088 = vrcp.f32 %v1497_v38  ;;  %v3569_v38 = vld [vmem:[%s3700_s8 + $0x8] sm:$0x3f] }
 0xf3e   :  { %v1500_v36 = vpop.xlane.xlu0 %1499  ;;  %v1736_v43 = vpop.permute.xlu1 %1735 }
 0xf3f   :  { %3090 = vrcp.f32 %v1500_v36  ;;  %v2009_v36 = vrot.slane %v3569_v38, %v3285_v27 }
 0xf42   :  { %v1658_v42 = vpop.permute.xlu0 %1657 }
 0xf45   :  { %v3089_v39 = vpop.eup %3088 }
 0xf46   :  { %v1503_v40 = vmul.f32 %v3089_v39, %v3085_v31 }
 0xf48   :  { %2863 = vmatmul.mubr.msk.f32.vlgmr.msra.gmra.mrb[12].mxu0 %vm336_vm3, %v1503_v40 }
 0xf49   :  { %v3091_v12 = vpop.eup %3090  ;;  %2871 = vmatpush3.xpose.msk.msra.mxu0 %vm170_vm2, %v1660_v34  ;;  %2872 = vmatprep.mubr.msk.f32.mxu0 %vm3143_vm1, %v3142_v8 }
 0xf4a   :  { %v1504_v41 = vmul.f32 %v3091_v12, %v3087_v13  ;;  %2880 = vmatprep.subr.mxu0 %v3142_v8 }
 0xf4c   :  { %2868 = vmatmul.mubr.msk.f32.vlgmr.msra.gmra.mrb[18].mxu1 %vm336_vm3, %v1504_v41  ;;  %2873 = vmatmul.mubr.msk.f32.vlgmr.msra.gmra.mrb[14].mxu0 %vm170_vm2, %v1658_v42 }
 0xf4d   :  { %2876 = vmatpush3.xpose.msk.msra.mxu1 %vm170_vm2, %v1738_v37  ;;  %2877 = vmatprep.mubr.msk.f32.mxu1 %vm3143_vm1, %v3142_v8 }
 0xf4e   :  { %2885 = vmatprep.subr.mxu1 %v3142_v8  ;;  %2882 = vmatprep.mubr.msk.f32.mxu0 %vm3143_vm1, %v3142_v8 }
 0xf50   :  { %2878 = vmatmul.mubr.msk.f32.vlgmr.msra.gmra.mrb[20].mxu1 %vm170_vm2, %v1736_v43 }
 0xf51   :  { %2887 = vmatprep.mubr.msk.f32.mxu1 %vm3143_vm1, %v3142_v8 }
0x101b   :  { %v3530_v44 = vpop.f32.mrb[12].mxu0 }
0x101c   :  { %v2864_v45 = vpop.f32.mrb[13].mxu0 }
0x101f   :  { %v3532_v46 = vpop.f32.mrb[18].mxu1  ;;  %v1731_v47 = vpop.f32.mrb[14].mxu0 }
0x1020   :  { %v1813_v48 = vmul.f32 0.25, %v1731_v47  ;;  %v2869_v51 = vpop.f32.mrb[19].mxu1  ;;  %v2874_v52 = vpop.f32.mrb[15].mxu0 }
0x1022   :  { %v1815_v54 = vadd.f32 %v1813_v48, %v3288_v29 }
0x1023   :  { %v1809_v55 = vpop.f32.mrb[20].mxu1 }
0x1024   :  { %v1814_v56 = vmul.f32 0.25, %v1809_v55  ;;  %v2879_v57 = vpop.f32.mrb[21].mxu1  ;;  %v1817_v58 = vsel %vm336_vm3, %v1815_v54, -inf }
0x1025   :  { %1818 = vmax.xlane.f32.xlu0 %v1817_v58  ;;  %v2628_v57 = vld [vmem:[%s3697_s5 + $0x28] sm:$0xff] }
0x1026   :  { %v1816_v59 = vadd.f32 %v1814_v56, %v3292_v35 }
0x1028   :  { %v1820_v62 = vsel %vm336_vm3, %v1816_v59, -inf }
0x1029   :  { %1821 = vmax.xlane.f32.xlu1 %v1820_v62  ;;  %v2630_v62 = vld [vmem:[%s3697_s5 + $0x38] sm:$0xff] }
0x103a   :  { %1839 = vrot.lane.b32.xlu1 %v3476_v1, %s3149_s26 }
0x10b2   :  { %v1819_v53 = vpop.xlane.xlu0 %1818 }
0x10b3   :  { %v1823_v0 = vsub.f32 %v1815_v54, %v1819_v53 }
0x10b5   :  { %v1825_v2 = vmul.f32 1.442695, %v1823_v0 }
0x10b6   :  { %v1822_v3 = vpop.xlane.xlu1 %1821 }
0x10b7   :  { %3092 = vpow2.f32 %v1825_v2  ;;  %v1824_v29 = vsub.f32 %v1816_v59, %v1822_v3  ;;  %v2629_v59 = vld [vmem:[%s3697_s5 + $0x30] sm:$0xff] }
0x10b8   :  { %v3013_v53 = vpack.c.bf16 %v2630_v62, %v2629_v59 }
0x10b9   :  { %v1827_v4 = vmul.f32 1.442695, %v1824_v29 }
0x10ba   :  { %v1840_v6 = vpop.permute.xlu1 %1839 }
0x10bb   :  { %3094 = vpow2.f32 %v1827_v4  ;;  %2881 = vmatpush3.msra.mxu0 %v1840_v6 }
0x10c1   :  { %v3093_v9 = vpop.eup %3092 }
0x10c2   :  { %v1829_v10 = vsel %vm336_vm3, %v3093_v9, 0.0 }
0x10c3   :  { %1830 = vadd.xlane.f32.xlu0 %v1829_v10 }
0x10c5   :  { %v3095_v35 = vpop.eup %3094 }
0x10c6   :  { %v1832_v7 = vsel %vm336_vm3, %v3095_v35, 0.0 }
0x10c7   :  { %1833 = vadd.xlane.f32.xlu0 %v1832_v7  ;;  %v2128_v7 = vrot.slane %v3569_v38, %v981_v26  ;;  %v2636_v26 = vld [vmem:[%s3699_s7 + $0x48] sm:$0xff] }
0x10dd   :  { %1915 = vrot.lane.b32.xlu0 %v3474_v63, %s3149_s26  ;;  %v2622_v63 = vld [vmem:[%s3696_s4 + $0x28] sm:$0xff] }
0x10de   :  { %v3001_v20 = vpack.c.bf16 %v2622_v63, %v2621_v19  ;;  %v2637_v19 = vld [vmem:[%s3699_s7 + $0x50] sm:$0xff]  ;;  %v2638_v63 = vld [vmem:[%s3699_s7 + $0x58] sm:$0xff] }
0x10e0   :  { %3002 = vmatprep.subr.bf16.mxu0 %v3001_v20 }
0x1150   :  { %v1831_v1 = vpop.xlane.xlu0 %1830 }
0x1151   :  { %3096 = vrcp.f32 %v1831_v1 }
0x1154   :  { %v1834_v5 = vpop.xlane.xlu0 %1833 }
0x1155   :  { %3098 = vrcp.f32 %v1834_v5 }
0x1158   :  { %v1916_v14 = vpop.permute.xlu0 %1915 }
0x1159   :  { %2886 = vmatpush3.msra.mxu1 %v1916_v14 }
0x115b   :  { %v3097_v15 = vpop.eup %3096 }
0x115c   :  { %v1837_v16 = vmul.f32 %v3097_v15, %v3093_v9  ;;  %v2122_v9 = vrot.slane %v3569_v38, %v975_v25  ;;  %v2635_v25 = vld [vmem:[%s3699_s7 + $0x40] sm:$0xff] }
0x115e   :  { %2883 = vmatmul.mubr.msk.f32.vlgmr.msra.gmra.mrb[16].mxu0 %vm336_vm3, %v1837_v16 }
0x115f   :  { %v3099_v17 = vpop.eup %3098  ;;  %3004 = vmatpush3.bf16.msra.mxu0 %v3001_v20  ;;  %v3021_v20 = vpack.c.bf16 %v2638_v63, %v2637_v19 }
0x1160   :  { %v1838_v18 = vmul.f32 %v3099_v17, %v3095_v35  ;;  %3006 = vmatprep.subr.bf16.mxu0 %v3005_v24 }
0x1162   :  { %2888 = vmatmul.mubr.msk.f32.vlgmr.msra.gmra.mrb[22].mxu1 %vm336_vm3, %v1838_v18  ;;  %v3017_v18 = vpack.c.bf16 %v2636_v26, %v2635_v25  ;;  %v3151_v25 = vmov 0.0|0.0  }
0x1163   :  { %3008 = vmatpush3.bf16.msra.mxu0 %v3005_v24  ;;  %v3025_v24 = vpack.c.bf16 %v2640_v23, %v2639_v21 }
0x1164   :  { %3018 = vmatprep.subr.bf16.mxu0 %v3017_v18 }
0x1231   :  { %v1911_v28 = vpop.f32.mrb[16].mxu0 }
0x1232   :  { %1993 = vrot.lane.b32.xlu1 %v1911_v28, %s3150_s18  ;;  %v2884_v30 = vpop.f32.mrb[17].mxu0  ;;  %v2641_v28 = vld [vmem:[%s3699_s7 + $0x70] sm:$0xff] }
0x1233   :  { %v2642_v30 = vld [vmem:[%s3699_s7 + $0x78] sm:$0xff] }
0x1235   :  { %v1987_v31 = vpop.f32.mrb[22].mxu1 }
0x1236   :  { %1995 = vrot.lane.b32.xlu1 %v1987_v31, %s3150_s18  ;;  %v2889_v32 = vpop.f32.mrb[23].mxu1  ;;  %v3029_v31 = vpack.c.bf16 %v2642_v30, %v2641_v28 }
0x1237   :  { %v2632_v32 = vld [vmem:[%s3698_s6 + $0x1] ss:$0 sm:$0xff] }
0x12a4   :  { %v1994_v13 = vpop.permute.xlu1 %1993 }
0x12a5   :  { %v1999_v33 = vsel %vm170_vm2, %v3530_v44, %v1994_v13 }
0x12a6   :  { %2898 = vmatprep.mubr.msk.f32.mxu0 %vm85_vm0, %v1999_v33 }
0x12a8   :  { %v1996_v34 = vpop.permute.xlu1 %1995 }
0x12a9   :  { %v2000_v37 = vsel %vm170_vm2, %v3532_v46, %v1996_v34 }
0x12aa   :  { %2899 = vmatmul.mubr.msk.f32.vlgmr.msra.gmra.mrb[18].mxu0 %vm85_vm0, %v2000_v37 }
0x12ab   :  { %3020 = vmatpush3.bf16.msra.mxu0 %v3017_v18 }
0x12ac   :  { %3022 = vmatprep.subr.bf16.mxu0 %v3021_v20 }
0x12af   :  { %3024 = vmatpush3.bf16.msra.mxu0 %v3021_v20 }
0x12b0   :  { %3026 = vmatprep.subr.bf16.mxu0 %v3025_v24 }
0x12b3   :  { %3028 = vmatpush3.bf16.msra.mxu0 %v3025_v24  ;;  %v2368_v24 = vrot.slane %v3569_v38, %v1219_v49  ;;  %v2467_v49 = vld [vmem:[%s3703_s11] sm:$0xff] }
0x12b4   :  { %3030 = vmatprep.subr.bf16.mxu0 %v3029_v31 }
0x12b7   :  { %3032 = vmatpush3.bf16.msra.mxu0 %v3029_v31 }
0x137d   :  { %v2900_v39 = vpop.f32.mrb[18].mxu0 }
0x137e   :  { %v2088_v40 = vadd.f32 %v2900_v39, %v2009_v36  ;;  %v2082_v12 = vpop.f32.mrb[19].mxu0 }
0x137f   :  { %v2083_v41 = vadd.f32 %v2082_v12, %v2009_v36 }
0x1380   :  { %v2092_v42 = vadd.f32 %v2088_v40, %v3463_v61 }
0x1381   :  { %v2091_v43 = vadd.f32 %v2083_v41, %v3461_v60  ;;  %v2627_v60 = vld [vmem:[%s3697_s5 + $0x20] sm:$0xff] }
0x1382   :  { %v2096_v44 = vsel %vm85_vm0, %v2092_v42, 0.0  ;;  %v3009_v58 = vpack.c.bf16 %v2628_v57, %v2627_v60 }
0x1383   :  { %2097 = vadd.xlane.f32.xlu1 %v2096_v44  ;;  %v2093_v45 = vsel %vm85_vm0, %v2091_v43, 0.0 }
0x1384   :  { %2094 = vadd.xlane.f32.xlu0 %v2093_v45  ;;  %3010 = vmatprep.subr.bf16.mxu1 %v3009_v58 }
0x1385   :  { %3012 = vmatpush3.bf16.msra.mxu1 %v3009_v58 }
0x1386   :  { %3014 = vmatprep.subr.bf16.mxu1 %v3013_v53 }
0x1389   :  { %3016 = vmatpush3.bf16.msra.mxu1 %v3013_v53 }
0x138a   :  { %3033 = vmatprep.subr.bf16.mxu1 %v3151_v25 }
0x1410   :  { %v2098_v46 = vpop.xlane.xlu1 %2097 }
0x1411   :  { %v2100_v47 = vmul.f32 0.03125, %v2098_v46  ;;  %v2095_v48 = vpop.xlane.xlu0 %2094 }
0x1412   :  { %v2099_v51 = vmul.f32 0.03125, %v2095_v48 }
0x1413   :  { %v2102_v52 = vsub.f32 %v2092_v42, %v2100_v47 }
0x1414   :  { %v2101_v27 = vsub.f32 %v2091_v43, %v2099_v51 }
0x1415   :  { %v2104_v56 = vmul.f32 %v2102_v52, %v2102_v52 }
0x1416   :  { %v2103_v54 = vmul.f32 %v2101_v27, %v2101_v27 }
0x1417   :  { %v2108_v61 = vsel %vm85_vm0, %v2104_v56, 0.0 }
0x1418   :  { %v2105_v55 = vsel %vm85_vm0, %v2103_v54, 0.0 }
0x1419   :  { %2106 = vadd.xlane.f32.xlu0 %v2105_v55 }
0x141d   :  { %2109 = vadd.xlane.f32.xlu0 %v2108_v61  ;;  %v2255_v61 = vrot.slane %v3569_v38, %v1105_v11 }
0x14a6   :  { %v2107_v0 = vpop.xlane.xlu0 %2106 }
0x14a7   :  { %v2111_v2 = vmul.f32 0.03125, %v2107_v0 }
0x14a9   :  { %v2113_v3 = vadd.f32 1e-12, %v2111_v2 }
0x14aa   :  { %v2110_v29 = vpop.xlane.xlu0 %2109 }
0x14ab   :  { %3100 = vrsqrt.f32 %v2113_v3  ;;  %v2112_v4 = vmul.f32 0.03125, %v2110_v29 }
0x14ad   :  { %v2114_v6 = vadd.f32 1e-12, %v2112_v4 }
0x14af   :  { %3102 = vrsqrt.f32 %v2114_v6 }
0x14b5   :  { %v3101_v10 = vpop.eup %3100 }
0x14b6   :  { %v2117_v35 = vmul.f32 %v3101_v10, %v2101_v27 }
0x14b8   :  { %v2123_v1 = vmul.f32 %v2122_v9, %v2117_v35 }
0x14b9   :  { %v3103_v5 = vpop.eup %3102 }
0x14ba   :  { %v2118_v14 = vmul.f32 %v3103_v5, %v2102_v52  ;;  %v2129_v15 = vadd.f32 %v2128_v7, %v2123_v1  ;;  %v2382_v5 = vld [vmem:[%s3701_s9] sm:$0xff] }
0x14bc   :  { %v2124_v16 = vmul.f32 %v2122_v9, %v2118_v14  ;;  %2909 = vmatprep.mubr.msk.f32.mxu1 %vm85_vm0, %v2129_v15  ;;  %v2383_v14 = vld [vmem:[%s3701_s9 + $0x8] sm:$0xff] }
0x14be   :  { %v2130_v17 = vadd.f32 %v2128_v7, %v2124_v16  ;;  %v2384_v16 = vld [vmem:[%s3701_s9 + $0x10] sm:$0xff] }
0x14c0   :  { %2910 = vmatmul.mubr.msk.f32.vlgmr.msra.gmra.mrb[24].mxu1 %vm85_vm0, %v2130_v17 }
0x14c1   :  { %2939 = vmatprep.mubr.msk.f32.mxu1 %vm3143_vm1, %v3142_v8 }
0x1593   :  { %v2911_v13 = vpop.f32.mrb[24].mxu1 }
0x1594   :  { %v2222_v33 = vadd.f32 %v2911_v13, %v2632_v32  ;;  %v2216_v34 = vpop.f32.mrb[25].mxu1 }
0x1595   :  { %v2217_v37 = vadd.f32 %v2632_v32, %v2216_v34  ;;  %v2374_v32 = vrot.slane %v3569_v38, %v1225_v50  ;;  %v2469_v50 = vld [vmem:[%s3703_s11 + $0x10] sm:$0xff]  ;;  %v3040_v38 = vpack.c.bf16 %v2468_v22, %v2467_v49 }
0x1596   :  { %v2226_v36 = vmul.f32 %v2222_v33, %v2222_v33 }
0x1597   :  { %v2225_v39 = vmul.f32 %v2217_v37, %v2217_v37 }
0x1598   :  { %v2228_v40 = vmul.f32 %v2226_v36, %v2222_v33 }
0x1599   :  { %v2227_v12 = vmul.f32 %v2225_v39, %v2217_v37 }
0x159a   :  { %v2230_v41 = vmul.f32 0.044715, %v2228_v40 }
0x159b   :  { %v2229_v42 = vmul.f32 0.044715, %v2227_v12  ;;  %v2470_v12 = vld [vmem:[%s3703_s11 + $0x18] sm:$0xff] }
0x159c   :  { %v2232_v43 = vadd.f32 %v2230_v41, %v2222_v33  ;;  %v3043_v41 = vpack.c.bf16 %v2470_v12, %v2469_v50 }
0x159d   :  { %v2231_v44 = vadd.f32 %v2229_v42, %v2217_v37 }
0x159e   :  { %v2234_v45 = vmul.f32 0.7978846, %v2232_v43 }
0x159f   :  { %v2233_v46 = vmul.f32 0.7978846, %v2231_v44 }
0x15a0   :  { %3104 = vtanh.f32 %v2234_v45 }
0x15a1   :  { %3106 = vtanh.f32 %v2233_v46  ;;  %v2647_v46 = vld [vmem:[%s3704_s12] ss:$0 sm:$0xff] }
0x15aa   :  { %v3105_v47 = vpop.eup %3104 }
0x15ab   :  { %v3107_v48 = vpop.eup %3106  ;;  %v2238_v51 = vadd.f32 1.0, %v3105_v47 }
0x15ac   :  { %v2237_v52 = vadd.f32 1.0, %v3107_v48 }
0x15ad   :  { %v2240_v27 = vmul.f32 0.5, %v2238_v51 }
0x15ae   :  { %v2239_v54 = vmul.f32 0.5, %v2237_v52 }
0x15af   :  { %v2242_v56 = vmul.f32 %v2240_v27, %v2222_v33 }
0x15b0   :  { %v2241_v55 = vmul.f32 %v2239_v54, %v2217_v37 }
0x15b2   :  { %2928 = vmatprep.mubr.msk.f32.mxu0 %vm1107_vm4, %v2241_v55 }
0x15b3   :  { %2929 = vmatmul.mubr.msk.f32.vlgmr.msra.gmra.mrb[20].mxu0 %vm1107_vm4, %v2242_v56 }
0x1686   :  { %v2930_v60 = vpop.f32.mrb[20].mxu0 }
0x1687   :  { %v2334_v57 = vadd.f32 %v2930_v60, %v2255_v61  ;;  %v2328_v58 = vpop.f32.mrb[21].mxu0 }
0x1688   :  { %v2329_v59 = vadd.f32 %v2328_v58, %v2255_v61 }
0x1689   :  { %v2338_v62 = vadd.f32 %v2334_v57, %v2130_v17  ;;  %v2385_v17 = vld [vmem:[%s3701_s9 + $0x18] sm:$0xff] }
0x168a   :  { %v2337_v53 = vadd.f32 %v2329_v59, %v2129_v15  ;;  %v3034_v15 = vpack.c.bf16 %v2383_v14, %v2382_v5  ;;  %v3037_v26 = vpack.c.bf16 %v2385_v17, %v2384_v16 }
0x168b   :  { %v2342_v0 = vsel %vm85_vm0, %v2338_v62, 0.0 }
0x168c   :  { %2343 = vadd.xlane.f32.xlu1 %v2342_v0  ;;  %v2339_v2 = vsel %vm85_vm0, %v2337_v53, 0.0  ;;  %3035 = vmatpush3.bf16.msra.mxu1 %v3034_v15 }
0x168d   :  { %2340 = vadd.xlane.f32.xlu0 %v2339_v2  ;;  %3036 = vmatprep.subr.bf16.mxu1 %v3151_v25 }
0x1690   :  { %3038 = vmatpush3.bf16.msra.mxu1 %v3037_v26 }
0x1691   :  { %3039 = vmatprep.subr.bf16.mxu1 %v3151_v25 }
0x1719   :  { %v2344_v3 = vpop.xlane.xlu1 %2343 }
0x171a   :  { %v2346_v29 = vmul.f32 0.03125, %v2344_v3  ;;  %v2341_v4 = vpop.xlane.xlu0 %2340 }
0x171b   :  { %v2345_v6 = vmul.f32 0.03125, %v2341_v4 }
0x171c   :  { %v2348_v9 = vsub.f32 %v2338_v62, %v2346_v29 }
0x171d   :  { %v2347_v10 = vsub.f32 %v2337_v53, %v2345_v6 }
0x171e   :  { %v2350_v35 = vmul.f32 %v2348_v9, %v2348_v9 }
0x171f   :  { %v2349_v11 = vmul.f32 %v2347_v10, %v2347_v10 }
0x1720   :  { %v2354_v7 = vsel %vm85_vm0, %v2350_v35, 0.0 }
0x1721   :  { %2355 = vadd.xlane.f32.xlu1 %v2354_v7  ;;  %v2351_v1 = vsel %vm85_vm0, %v2349_v11, 0.0 }
0x1722   :  { %2352 = vadd.xlane.f32.xlu0 %v2351_v1 }
0x17ae   :  { %v2356_v18 = vpop.xlane.xlu1 %2355 }
0x17af   :  { %v2358_v19 = vmul.f32 0.03125, %v2356_v18  ;;  %v2353_v63 = vpop.xlane.xlu0 %2352 }
0x17b0   :  { %v2357_v20 = vmul.f32 0.03125, %v2353_v63 }
0x17b1   :  { %v2360_v21 = vadd.f32 1e-12, %v2358_v19 }
0x17b2   :  { %v2359_v23 = vadd.f32 1e-12, %v2357_v20 }
0x17b3   :  { %3108 = vrsqrt.f32 %v2360_v21 }
0x17b4   :  { %3110 = vrsqrt.f32 %v2359_v23 }
0x17bd   :  { %v3109_v28 = vpop.eup %3108 }
0x17be   :  { %v3111_v30 = vpop.eup %3110  ;;  %v2364_v31 = vmul.f32 %v3109_v28, %v2348_v9 }
0x17bf   :  { %v2363_v13 = vmul.f32 %v3111_v30, %v2347_v10 }
0x17c0   :  { %v2370_v33 = vmul.f32 %v2368_v24, %v2364_v31 }
0x17c1   :  { %v2369_v34 = vmul.f32 %v2368_v24, %v2363_v13 }
0x17c2   :  { %v2376_v37 = vadd.f32 %v2374_v32, %v2370_v33 }
0x17c3   :  { %v2375_v36 = vadd.f32 %v2374_v32, %v2369_v34 }
0x17c4   :  { %v2378_v39 = vrot.slane %v2376_v37, 7 }
0x17c6   :  { %v2381_v40 = vsel %vm2380_vm5, %v2375_v36, %v2378_v39 }
0x17c7   :  { %2940 = vmatmul.mubr.msk.f32.vlgmr.msra.gmra.mrb[26].mxu1 %vm85_vm0, %v2381_v40 }
0x17c8   :  { %2950 = vmatprep.mubr.msk.f32.mxu1 %vm3143_vm1, %v3142_v8  ;;  %3041 = vmatpush3.bf16.msra.mxu1 %v3040_v38  ;;  %v2645_v8 = vld [vmem:[%s3702_s10] ss:$0 sm:$0xff]  ;;  %s3152_s10 = smov [#allocation2]  }
0x17c9   :  { %3042 = vmatprep.subr.bf16.mxu1 %v3151_v25  ;;  %s2570_s11 = sshll.u32 %s3152_s10, 4  ;;  %s2571_s11 = int_to_ptr.vmem [resolvable:$true] %s2570_s11 }
0x17ca   :  { %s3118_s12 = scalar_lea.vmem %s2571_s11, 32  ;;  %p3123_p1 = scmp.lt.s32.totalorder %s2571_s11, %s2571_s11 }
0x17cb   :  { %p3119_p0 = scmp.ne.s32.totalorder %s2571_s11, %s3118_s12  ;;  %p3124_p2 = scmp.lt.s32.totalorder %s3118_s12, %s3118_s12 }
0x17cc   :  { %3044 = vmatpush3.bf16.msra.mxu1 %v3043_v41 }
0x17cd   :  { %p3125_p3 = por %p3124_p2, %p3123_p1 }
0x17cf   :  { %p3126_p4 = pnand %p3125_p3, %p3119_p0 }
0x189a   :  { %v2462_v42 = vpop.f32.mrb[26].mxu1 }
0x189b   :  { %v2463_v43 = vadd.f32 %v2645_v8, %v2462_v42  ;;  %v2941_v44 = vpop.f32.mrb[27].mxu1 }
0x189d   :  { %3112 = vtanh.f32 %v2463_v43 }
0x18a7   :  { %v3113_v45 = vpop.eup %3112 }
0x18a8   :  { %2951 = vmatmul.mubr.msk.f32.vlgmr.msra.gmra.mrb[28].mxu1 %vm85_vm0, %v3113_v45 }
0x197b   :  { %v2547_v47 = vpop.f32.mrb[28].mxu1 }
0x197c   :  { %v2548_v48 = vadd.f32 %v2647_v46, %v2547_v47  ;;  %v2952_v51 = vpop.f32.mrb[29].mxu1 }
0x197e   :  { %v2552_v52 = vsel %vm2551_vm6, %v2548_v48, -inf }
0x197f   :  { %2553 = vmax.xlane.f32.xlu1 %v2552_v52 }
0x1a0c   :  { %v2554_v27 = vpop.xlane.xlu1 %2553 }
0x1a0d   :  { %v2555_v54 = vsub.f32 %v2548_v48, %v2554_v27 }
0x1a0f   :  { %v2556_v55 = vmul.f32 1.442695, %v2555_v54 }
0x1a11   :  { %3114 = vpow2.f32 %v2556_v55 }
0x1a1b   :  { %v3115_v56 = vpop.eup %3114 }
0x1a1c   :  { %v2558_v61 = vsel %vm2551_vm6, %v3115_v56, 0.0 }
0x1a1d   :  { %2559 = vadd.xlane.f32.xlu0 %v2558_v61 }
0x1aaa   :  { %v2560_v60 = vpop.xlane.xlu0 %2559 }
0x1aab   :  { %3116 = vrcp.f32 %v2560_v60 }
0x1ab5   :  { %v3117_v57 = vpop.eup %3116 }
0x1ab6   :  { %v2562_v58 = vmul.f32 %v3117_v57, %v3115_v56 }
0x1ab8   :  { %2563 = vst.msk [vmem:[#allocation2] sm:$0x3] %vm2551_vm6, %v2562_v58 }
0x1ab9   :  { %3129 = shalt.err (!%p3126_p4)
}
0x1aba   :  { %s3130_s17 = scalar_lea.hbm %s3705_s13, 32 }
0x1abb   :  { %p3131_p5 = scmp.ne.s32.totalorder %s3705_s13, %s3130_s17  ;;  %p3134_p6 = scmp.lt.u32.totalorder %s3130_s17, %s3705_s13 }
0x1abd   :  { %p3136_p7 = pnand %p3134_p6, %p3131_p5 }
0x1abf   :  { %3139 = shalt.err (!%p3136_p7)
}
0x1ac0   :  { %2573 = dma.vmem_to_hbm [thread:$0]  %s2571_s11, 32, %s3705_s13, [#allocation3]  }
0x1ac1   :  { %3140 = dma.done.wait [#allocation3], 32  }
0x1ac2   :  { %3141 = vsyncadd [#allocation3], 4294967264 }
0x1ac3   :  { %2577 = vsyncpa [#allocation3], 1 }

</bundles_post_ra>
